<compile_context>
chip_gen: v5e
topology: v5e:2x2
jax: 0.10.0
libtpu: 0.0.40
codegen_flags: <defaults>
</compile_context>

<pallas_src>
import functools

import jax
import jax.numpy as jnp
from jax import lax
from jax.experimental import pallas as pl
from jax.experimental.pallas import tpu as pltpu


# ----------------------------------------------------------------------------
# Pallas kernel: in-kernel embedding gather + 2-layer LSTM + final Linear.
# Packed gate column order is [i, f, o, g].
# ----------------------------------------------------------------------------
def _lstm_kernel(S, B, B_pad, vocab_train, fix_step,
                 tokens_ref,                    # (S, B) int32   SMEM
                 h0_ref, c0_ref,                # (2, B_pad, H)  f32
                 emb_ref,                       # (VE, E)        packed tables
                 wih0_ref, whh0_ref, b0_ref,    # (E,4H) (H,4H) (1,4H)
                 wih1_ref, whh1_ref, b1_ref,    # (H,4H) (H,4H) (1,4H)
                 wlin_ref, blin_ref,            # (H,Vp) (1,Vp)  lane-padded
                 logits_ref,                    # (S*B_pad, Vp)  out
                 hn_ref, cn_ref,                # (2, B_pad, H)  out
                 hbuf_ref):                     # (S*B_pad, H)   VMEM scratch
    H = h0_ref.shape[2]
    VE = emb_ref.shape[0]

    # ---- in-kernel embedding gather via one-hot matmul ---------------------
    # tokens are tiny scalars in SMEM; one-hot rows are built with
    # scalar-broadcast compares (VALU), then a single MXU matmul gathers the
    # embeddings for all timesteps.  Timestep `fix_step` indexes the frozen
    # table, which is packed at row offset `vocab_train`.
    lane_ve = lax.broadcasted_iota(jnp.int32, (B_pad, VE), 1)
    sub_ve = lax.broadcasted_iota(jnp.int32, (B_pad, VE), 0)
    oh_rows = []
    for t in range(S):
        off = vocab_train if t == fix_step else 0
        oh_t = jnp.zeros((B_pad, VE), jnp.float32)
        for b in range(B):           # padded batch rows stay all-zero
            tok = tokens_ref[t, b] + off
            oh_t = jnp.where((sub_ve == b) & (lane_ve == tok), 1.0, oh_t)
        oh_rows.append(oh_t)
    onehot = jnp.concatenate(oh_rows, axis=0)               # (S*B_pad, VE)

    embeds = jnp.dot(onehot, emb_ref[...],
                     preferred_element_type=jnp.float32)    # (S*B_pad, E)

    # Hoisted layer-0 input projection for all timesteps, input bias folded in.
    xproj = (jnp.dot(embeds, wih0_ref[...],
                     preferred_element_type=jnp.float32)
             + b0_ref[...])                                 # (S*B_pad, 4H)

    # Hoisted weight loads / broadcasts (loop below is statically unrolled).
    whh0 = whh0_ref[...]
    wih1 = wih1_ref[...]
    whh1 = whh1_ref[...]
    b1 = jnp.broadcast_to(b1_ref[...], (B_pad, 4 * H))

    # Gate order [i, f, o, g]: cols [0:3H] -> sigmoid, [3H:4H] -> tanh.
    lane4h = lax.broadcasted_iota(jnp.int32, (B_pad, 4 * H), 1)
    sig_mask = lane4h < 3 * H

    def gates_to_hc(g, c_prev):
        # Single EUP pass: tanh(x) = 2*sigmoid(2x) - 1.
        s = jax.nn.sigmoid(jnp.where(sig_mask, g, 2.0 * g))
        act = jnp.where(sig_mask, s, 2.0 * s - 1.0)
        i = act[:, 0:H]
        f = act[:, H:2 * H]
        o = act[:, 2 * H:3 * H]
        gg = act[:, 3 * H:4 * H]
        c_new = f * c_prev + i * gg
        h_new = o * jnp.tanh(c_new)
        return h_new, c_new

    h1 = h0_ref[0]
    c1 = c0_ref[0]
    h2 = h0_ref[1]
    c2 = c0_ref[1]

    # Static unroll over timesteps (S small & fixed): static-offset,
    # sublane-tile-aligned slices/stores and full scheduling visibility.
    for t in range(S):
        # Both hidden-path matmuls depend only on previous-step state: issue
        # them first so they overlap the layer-0 activations.
        hh1 = jnp.dot(h1, whh0, preferred_element_type=jnp.float32)
        hh2 = jnp.dot(h2, whh1, preferred_element_type=jnp.float32)

        g1 = xproj[t * B_pad:(t + 1) * B_pad, :] + hh1
        h1, c1 = gates_to_hc(g1, c1)

        g2 = jnp.dot(h1, wih1, preferred_element_type=jnp.float32) + hh2 + b1
        h2, c2 = gates_to_hc(g2, c2)

        hbuf_ref[t * B_pad:(t + 1) * B_pad, :] = h2     # aligned static store

    hn_ref[0] = h1
    hn_ref[1] = h2
    cn_ref[0] = c1
    cn_ref[1] = c2

    # Final linear over all timesteps at once; lane-dense (Vp) output.
    logits_ref[...] = (jnp.dot(hbuf_ref[...], wlin_ref[...],
                               preferred_element_type=jnp.float32)
                       + blin_ref[...])


# ----------------------------------------------------------------------------
# One-time (outside jit) parameter packing.
# ----------------------------------------------------------------------------
def _permute_gates(w):
    """Reorder the 4H gate axis from PyTorch [i, f, g, o] to [i, f, o, g]."""
    i, f, g, o = jnp.split(w, 4, axis=-1)
    return jnp.concatenate([i, f, o, g], axis=-1)


def _round_up(x, m):
    return ((x + m - 1) // m) * m


def pack_params(params, vocab_train, vocab_fix):
    """Repack raw params into kernel layout. Call ONCE, outside jit."""
    E = params["emb_train"].shape[1]
    H = params["w_hh0"].shape[0]
    V = params["w_lin"].shape[1]
    VE = max(128, _round_up(vocab_train + vocab_fix, 128))   # lane-dense onehot
    Vp = max(128, _round_up(V, 128))                         # lane-dense logits

    emb = jnp.zeros((VE, E), jnp.float32)
    emb = emb.at[:vocab_train].set(params["emb_train"])
    emb = emb.at[vocab_train:vocab_train + vocab_fix].set(params["emb_fix"])

    return {
        "emb": emb,
        "wih0": _permute_gates(params["w_ih0"]),
        "whh0": _permute_gates(params["w_hh0"]),
        "b0": _permute_gates(params["b0"]),
        "wih1": _permute_gates(params["w_ih1"]),
        "whh1": _permute_gates(params["w_hh1"]),
        "b1": _permute_gates(params["b1"]),
        "wlin": jnp.zeros((H, Vp), jnp.float32).at[:, :V].set(params["w_lin"]),
        "blin": jnp.zeros((1, Vp), jnp.float32).at[:, :V].set(params["b_lin"]),
    }


# ----------------------------------------------------------------------------
# Forward wrapper (mark=None path of TrainingModel_Vec)
# ----------------------------------------------------------------------------
def forward(packed, tokens, *, hidden_dim, vocab_train, vocab_out,
            b_pad=8, fix_step=2):
    """tokens: (seq_len, batch) int32; hidden=None path (zero init state)."""
    S, B = tokens.shape
    B_pad = max(b_pad, B)
    H = hidden_dim
    Vp = packed["wlin"].shape[1]

    h0 = jnp.zeros((2, B_pad, H), jnp.float32)
    c0 = jnp.zeros((2, B_pad, H), jnp.float32)

    kernel = functools.partial(_lstm_kernel, S, B, B_pad, vocab_train, fix_step)

    smem = pl.BlockSpec(memory_space=pltpu.MemorySpace.SMEM)
    vmem = pl.BlockSpec(memory_space=pltpu.MemorySpace.VMEM)

    out_shape = (
        jax.ShapeDtypeStruct((S * B_pad, Vp), jnp.float32),   # padded logits
        jax.ShapeDtypeStruct((2, B_pad, H), jnp.float32),     # h_n (padded B)
        jax.ShapeDtypeStruct((2, B_pad, H), jnp.float32),     # c_n (padded B)
    )

    logits_pad, h_n, c_n = pl.pallas_call(
        kernel,
        out_shape=out_shape,
        in_specs=[smem] + [vmem] * 11,
        out_specs=(vmem, vmem, vmem),
        scratch_shapes=[pltpu.VMEM((S * B_pad, H), jnp.float32)],
    )(tokens, h0, c0, packed["emb"],
      packed["wih0"], packed["whh0"], packed["b0"],
      packed["wih1"], packed["whh1"], packed["b1"],
      packed["wlin"], packed["blin"])

    logits = logits_pad.reshape(S, B_pad, Vp)[:, :B, :vocab_out]
    logits = logits.reshape(S * B, vocab_out)
    return logits, (h_n[:, :B, :], c_n[:, :B, :])


# ----------------------------------------------------------------------------
# Raw parameter init (PyTorch conventions, gate order [i, f, g, o]).
# ----------------------------------------------------------------------------
def init_params(key, vocab_train, vocab_fix, embedding_dim, hidden_dim):
    H, E = hidden_dim, embedding_dim
    V = vocab_fix + vocab_train
    ks = jax.random.split(key, 12)
    u = lambda k, shape, scale: jax.random.uniform(k, shape, jnp.float32,
                                                   -scale, scale)
    s = 1.0 / jnp.sqrt(H)
    return {
        "emb_train": jax.random.normal(ks[0], (vocab_train, E), jnp.float32),
        "emb_fix": jax.random.normal(ks[1], (vocab_fix, E), jnp.float32),
        "w_ih0": u(ks[2], (E, 4 * H), s),
        "w_hh0": u(ks[3], (H, 4 * H), s),
        "b0": u(ks[4], (1, 4 * H), s) + u(ks[5], (1, 4 * H), s),  # b_ih + b_hh
        "w_ih1": u(ks[6], (H, 4 * H), s),
        "w_hh1": u(ks[7], (H, 4 * H), s),
        "b1": u(ks[8], (1, 4 * H), s) + u(ks[9], (1, 4 * H), s),
        "w_lin": u(ks[10], (H, V), s),
        "b_lin": u(ks[11], (1, V), s),
    }


# ----------------------------------------------------------------------------
# Pure-JAX reference (PyTorch gate order / math) for a sanity check.
# ----------------------------------------------------------------------------
def _ref_forward(params, tokens, hidden_dim):
    S, B = tokens.shape
    H = hidden_dim
    emb_change = jnp.take(params["emb_train"],
                          jnp.concatenate([tokens[0:2], tokens[3:]], axis=0),
                          axis=0)
    emb_fix = jnp.take(params["emb_fix"], tokens[2:3], axis=0)
    embeds = jnp.concatenate([emb_change[0:2], emb_fix, emb_change[2:]], axis=0)

    def cell(x, h, c, wih, whh, b):
        g = x @ wih + h @ whh + b
        i = jax.nn.sigmoid(g[:, 0:H])
        f = jax.nn.sigmoid(g[:, H:2 * H])
        gg = jnp.tanh(g[:, 2 * H:3 * H])
        o = jax.nn.sigmoid(g[:, 3 * H:4 * H])
        c_new = f * c + i * gg
        return o * jnp.tanh(c_new), c_new

    def step(carry, x):
        h1, c1, h2, c2 = carry
        h1, c1 = cell(x, h1, c1, params["w_ih0"], params["w_hh0"], params["b0"])
        h2, c2 = cell(h1, h2, c2, params["w_ih1"], params["w_hh1"], params["b1"])
        return (h1, c1, h2, c2), h2

    z = jnp.zeros((B, H), jnp.float32)
    (h1, c1, h2, c2), outs = lax.scan(step, (z, z, z, z), embeds)
    logits = outs.reshape(S * B, H) @ params["w_lin"] + params["b_lin"]
    return logits, (jnp.stack([h1, h2]), jnp.stack([c1, c2]))


# ----------------------------------------------------------------------------
if __name__ == "__main__":
    vocab_size_train = 16
    vocab_size_fix = 8
    embedding_dim = 32
    hidden_dim = 32
    seq_len, batch = 8, 2

    key = jax.random.PRNGKey(0)
    pkey, tkey = jax.random.split(key)
    params = init_params(pkey, vocab_size_train, vocab_size_fix,
                         embedding_dim, hidden_dim)

    # One-time weight packing, OUTSIDE the jitted forward.
    packed = pack_params(params, vocab_size_train, vocab_size_fix)

    # timestep 2 indexes the (smaller) fixed vocab; keep all rows valid for it
    tokens = jax.random.randint(tkey, (seq_len, batch), 0, vocab_size_fix,
                                dtype=jnp.int32)

    V = vocab_size_fix + vocab_size_train
    fwd = jax.jit(functools.partial(forward, hidden_dim=hidden_dim,
                                    vocab_train=vocab_size_train,
                                    vocab_out=V))
    logits, (h_n, c_n) = fwd(packed, tokens)
    jax.block_until_ready((logits, h_n, c_n))

    # sanity check against pure-JAX reference
    ref_logits, (ref_h, ref_c) = _ref_forward(params, tokens, hidden_dim)
    assert logits.shape == (seq_len * batch, V)
    assert h_n.shape == (2, batch, hidden_dim)
    assert jnp.allclose(logits, ref_logits, atol=1e-4, rtol=1e-4)
    assert jnp.allclose(h_n, ref_h, atol=1e-4, rtol=1e-4)
    assert jnp.allclose(c_n, ref_c, atol=1e-4, rtol=1e-4)

    print("KERNEL_OK")
</pallas_src>

<mosaic_0001>
module attributes {stable_mosaic.version = 11 : i64} {
  func.func @_lstm_kernel(%arg0: memref<8x2xi32, #tpu.memory_space<smem>>, %arg1: memref<2x8x32xf32, #tpu.memory_space<vmem>>, %arg2: memref<2x8x32xf32, #tpu.memory_space<vmem>>, %arg3: memref<128x32xf32, #tpu.memory_space<vmem>>, %arg4: memref<32x128xf32, #tpu.memory_space<vmem>>, %arg5: memref<32x128xf32, #tpu.memory_space<vmem>>, %arg6: memref<1x128xf32, #tpu.memory_space<vmem>>, %arg7: memref<32x128xf32, #tpu.memory_space<vmem>>, %arg8: memref<32x128xf32, #tpu.memory_space<vmem>>, %arg9: memref<1x128xf32, #tpu.memory_space<vmem>>, %arg10: memref<32x128xf32, #tpu.memory_space<vmem>>, %arg11: memref<1x128xf32, #tpu.memory_space<vmem>>, %arg12: memref<64x128xf32, #tpu.memory_space<vmem>>, %arg13: memref<2x8x32xf32, #tpu.memory_space<vmem>>, %arg14: memref<2x8x32xf32, #tpu.memory_space<vmem>>, %arg15: memref<64x32xf32, #tpu.memory_space<vmem>>) attributes {dimension_semantics = [], scalar_prefetch = 0 : i64, scratch_operands = 1 : i64, tpu.core_type = #tpu.core_type<tc>} {
    %0 = tpu.iota {dimensions = array<i32: 1>} : vector<8x128xi32>
    %1 = tpu.iota {dimensions = array<i32: 0>} : vector<8x128xi32>
    %cst = arith.constant 0.000000e+00 : f32
    %2 = vector.broadcast %cst : f32 to vector<8x128xf32>
    %c0 = arith.constant 0 : index
    %c0_0 = arith.constant 0 : index
    %3 = memref.load %arg0[%c0, %c0_0] : memref<8x2xi32, #tpu.memory_space<smem>>
    %c0_i32 = arith.constant 0 : i32
    %4 = arith.addi %3, %c0_i32 : i32
    %c0_i32_1 = arith.constant 0 : i32
    %5 = vector.broadcast %c0_i32_1 : i32 to vector<8x128xi32>
    %6 = arith.cmpi eq, %1, %5 : vector<8x128xi32>
    %7 = vector.broadcast %4 : i32 to vector<8x128xi32>
    %8 = arith.cmpi eq, %0, %7 : vector<8x128xi32>
    %9 = arith.andi %6, %8 : vector<8x128xi1>
    %cst_2 = arith.constant 1.000000e+00 : f32
    %10 = vector.broadcast %cst_2 : f32 to vector<8x128xf32>
    %11 = arith.select %9, %10, %2 : vector<8x128xi1>, vector<8x128xf32>
    %c0_3 = arith.constant 0 : index
    %c1 = arith.constant 1 : index
    %12 = memref.load %arg0[%c0_3, %c1] : memref<8x2xi32, #tpu.memory_space<smem>>
    %c0_i32_4 = arith.constant 0 : i32
    %13 = arith.addi %12, %c0_i32_4 : i32
    %c1_i32 = arith.constant 1 : i32
    %14 = vector.broadcast %c1_i32 : i32 to vector<8x128xi32>
    %15 = arith.cmpi eq, %1, %14 : vector<8x128xi32>
    %16 = vector.broadcast %13 : i32 to vector<8x128xi32>
    %17 = arith.cmpi eq, %0, %16 : vector<8x128xi32>
    %18 = arith.andi %15, %17 : vector<8x128xi1>
    %cst_5 = arith.constant 1.000000e+00 : f32
    %19 = vector.broadcast %cst_5 : f32 to vector<8x128xf32>
    %20 = arith.select %18, %19, %11 : vector<8x128xi1>, vector<8x128xf32>
    %cst_6 = arith.constant 0.000000e+00 : f32
    %21 = vector.broadcast %cst_6 : f32 to vector<8x128xf32>
    %c1_7 = arith.constant 1 : index
    %c0_8 = arith.constant 0 : index
    %22 = memref.load %arg0[%c1_7, %c0_8] : memref<8x2xi32, #tpu.memory_space<smem>>
    %c0_i32_9 = arith.constant 0 : i32
    %23 = arith.addi %22, %c0_i32_9 : i32
    %c0_i32_10 = arith.constant 0 : i32
    %24 = vector.broadcast %c0_i32_10 : i32 to vector<8x128xi32>
    %25 = arith.cmpi eq, %1, %24 : vector<8x128xi32>
    %26 = vector.broadcast %23 : i32 to vector<8x128xi32>
    %27 = arith.cmpi eq, %0, %26 : vector<8x128xi32>
    %28 = arith.andi %25, %27 : vector<8x128xi1>
    %cst_11 = arith.constant 1.000000e+00 : f32
    %29 = vector.broadcast %cst_11 : f32 to vector<8x128xf32>
    %30 = arith.select %28, %29, %21 : vector<8x128xi1>, vector<8x128xf32>
    %c1_12 = arith.constant 1 : index
    %c1_13 = arith.constant 1 : index
    %31 = memref.load %arg0[%c1_12, %c1_13] : memref<8x2xi32, #tpu.memory_space<smem>>
    %c0_i32_14 = arith.constant 0 : i32
    %32 = arith.addi %31, %c0_i32_14 : i32
    %c1_i32_15 = arith.constant 1 : i32
    %33 = vector.broadcast %c1_i32_15 : i32 to vector<8x128xi32>
    %34 = arith.cmpi eq, %1, %33 : vector<8x128xi32>
    %35 = vector.broadcast %32 : i32 to vector<8x128xi32>
    %36 = arith.cmpi eq, %0, %35 : vector<8x128xi32>
    %37 = arith.andi %34, %36 : vector<8x128xi1>
    %cst_16 = arith.constant 1.000000e+00 : f32
    %38 = vector.broadcast %cst_16 : f32 to vector<8x128xf32>
    %39 = arith.select %37, %38, %30 : vector<8x128xi1>, vector<8x128xf32>
    %cst_17 = arith.constant 0.000000e+00 : f32
    %40 = vector.broadcast %cst_17 : f32 to vector<8x128xf32>
    %c2 = arith.constant 2 : index
    %c0_18 = arith.constant 0 : index
    %41 = memref.load %arg0[%c2, %c0_18] : memref<8x2xi32, #tpu.memory_space<smem>>
    %c16_i32 = arith.constant 16 : i32
    %42 = arith.addi %41, %c16_i32 : i32
    %c0_i32_19 = arith.constant 0 : i32
    %43 = vector.broadcast %c0_i32_19 : i32 to vector<8x128xi32>
    %44 = arith.cmpi eq, %1, %43 : vector<8x128xi32>
    %45 = vector.broadcast %42 : i32 to vector<8x128xi32>
    %46 = arith.cmpi eq, %0, %45 : vector<8x128xi32>
    %47 = arith.andi %44, %46 : vector<8x128xi1>
    %cst_20 = arith.constant 1.000000e+00 : f32
    %48 = vector.broadcast %cst_20 : f32 to vector<8x128xf32>
    %49 = arith.select %47, %48, %40 : vector<8x128xi1>, vector<8x128xf32>
    %c2_21 = arith.constant 2 : index
    %c1_22 = arith.constant 1 : index
    %50 = memref.load %arg0[%c2_21, %c1_22] : memref<8x2xi32, #tpu.memory_space<smem>>
    %c16_i32_23 = arith.constant 16 : i32
    %51 = arith.addi %50, %c16_i32_23 : i32
    %c1_i32_24 = arith.constant 1 : i32
    %52 = vector.broadcast %c1_i32_24 : i32 to vector<8x128xi32>
    %53 = arith.cmpi eq, %1, %52 : vector<8x128xi32>
    %54 = vector.broadcast %51 : i32 to vector<8x128xi32>
    %55 = arith.cmpi eq, %0, %54 : vector<8x128xi32>
    %56 = arith.andi %53, %55 : vector<8x128xi1>
    %cst_25 = arith.constant 1.000000e+00 : f32
    %57 = vector.broadcast %cst_25 : f32 to vector<8x128xf32>
    %58 = arith.select %56, %57, %49 : vector<8x128xi1>, vector<8x128xf32>
    %cst_26 = arith.constant 0.000000e+00 : f32
    %59 = vector.broadcast %cst_26 : f32 to vector<8x128xf32>
    %c3 = arith.constant 3 : index
    %c0_27 = arith.constant 0 : index
    %60 = memref.load %arg0[%c3, %c0_27] : memref<8x2xi32, #tpu.memory_space<smem>>
    %c0_i32_28 = arith.constant 0 : i32
    %61 = arith.addi %60, %c0_i32_28 : i32
    %c0_i32_29 = arith.constant 0 : i32
    %62 = vector.broadcast %c0_i32_29 : i32 to vector<8x128xi32>
    %63 = arith.cmpi eq, %1, %62 : vector<8x128xi32>
    %64 = vector.broadcast %61 : i32 to vector<8x128xi32>
    %65 = arith.cmpi eq, %0, %64 : vector<8x128xi32>
    %66 = arith.andi %63, %65 : vector<8x128xi1>
    %cst_30 = arith.constant 1.000000e+00 : f32
    %67 = vector.broadcast %cst_30 : f32 to vector<8x128xf32>
    %68 = arith.select %66, %67, %59 : vector<8x128xi1>, vector<8x128xf32>
    %c3_31 = arith.constant 3 : index
    %c1_32 = arith.constant 1 : index
    %69 = memref.load %arg0[%c3_31, %c1_32] : memref<8x2xi32, #tpu.memory_space<smem>>
    %c0_i32_33 = arith.constant 0 : i32
    %70 = arith.addi %69, %c0_i32_33 : i32
    %c1_i32_34 = arith.constant 1 : i32
    %71 = vector.broadcast %c1_i32_34 : i32 to vector<8x128xi32>
    %72 = arith.cmpi eq, %1, %71 : vector<8x128xi32>
    %73 = vector.broadcast %70 : i32 to vector<8x128xi32>
    %74 = arith.cmpi eq, %0, %73 : vector<8x128xi32>
    %75 = arith.andi %72, %74 : vector<8x128xi1>
    %cst_35 = arith.constant 1.000000e+00 : f32
    %76 = vector.broadcast %cst_35 : f32 to vector<8x128xf32>
    %77 = arith.select %75, %76, %68 : vector<8x128xi1>, vector<8x128xf32>
    %cst_36 = arith.constant 0.000000e+00 : f32
    %78 = vector.broadcast %cst_36 : f32 to vector<8x128xf32>
    %c4 = arith.constant 4 : index
    %c0_37 = arith.constant 0 : index
    %79 = memref.load %arg0[%c4, %c0_37] : memref<8x2xi32, #tpu.memory_space<smem>>
    %c0_i32_38 = arith.constant 0 : i32
    %80 = arith.addi %79, %c0_i32_38 : i32
    %c0_i32_39 = arith.constant 0 : i32
    %81 = vector.broadcast %c0_i32_39 : i32 to vector<8x128xi32>
    %82 = arith.cmpi eq, %1, %81 : vector<8x128xi32>
    %83 = vector.broadcast %80 : i32 to vector<8x128xi32>
    %84 = arith.cmpi eq, %0, %83 : vector<8x128xi32>
    %85 = arith.andi %82, %84 : vector<8x128xi1>
    %cst_40 = arith.constant 1.000000e+00 : f32
    %86 = vector.broadcast %cst_40 : f32 to vector<8x128xf32>
    %87 = arith.select %85, %86, %78 : vector<8x128xi1>, vector<8x128xf32>
    %c4_41 = arith.constant 4 : index
    %c1_42 = arith.constant 1 : index
    %88 = memref.load %arg0[%c4_41, %c1_42] : memref<8x2xi32, #tpu.memory_space<smem>>
    %c0_i32_43 = arith.constant 0 : i32
    %89 = arith.addi %88, %c0_i32_43 : i32
    %c1_i32_44 = arith.constant 1 : i32
    %90 = vector.broadcast %c1_i32_44 : i32 to vector<8x128xi32>
    %91 = arith.cmpi eq, %1, %90 : vector<8x128xi32>
    %92 = vector.broadcast %89 : i32 to vector<8x128xi32>
    %93 = arith.cmpi eq, %0, %92 : vector<8x128xi32>
    %94 = arith.andi %91, %93 : vector<8x128xi1>
    %cst_45 = arith.constant 1.000000e+00 : f32
    %95 = vector.broadcast %cst_45 : f32 to vector<8x128xf32>
    %96 = arith.select %94, %95, %87 : vector<8x128xi1>, vector<8x128xf32>
    %cst_46 = arith.constant 0.000000e+00 : f32
    %97 = vector.broadcast %cst_46 : f32 to vector<8x128xf32>
    %c5 = arith.constant 5 : index
    %c0_47 = arith.constant 0 : index
    %98 = memref.load %arg0[%c5, %c0_47] : memref<8x2xi32, #tpu.memory_space<smem>>
    %c0_i32_48 = arith.constant 0 : i32
    %99 = arith.addi %98, %c0_i32_48 : i32
    %c0_i32_49 = arith.constant 0 : i32
    %100 = vector.broadcast %c0_i32_49 : i32 to vector<8x128xi32>
    %101 = arith.cmpi eq, %1, %100 : vector<8x128xi32>
    %102 = vector.broadcast %99 : i32 to vector<8x128xi32>
    %103 = arith.cmpi eq, %0, %102 : vector<8x128xi32>
    %104 = arith.andi %101, %103 : vector<8x128xi1>
    %cst_50 = arith.constant 1.000000e+00 : f32
    %105 = vector.broadcast %cst_50 : f32 to vector<8x128xf32>
    %106 = arith.select %104, %105, %97 : vector<8x128xi1>, vector<8x128xf32>
    %c5_51 = arith.constant 5 : index
    %c1_52 = arith.constant 1 : index
    %107 = memref.load %arg0[%c5_51, %c1_52] : memref<8x2xi32, #tpu.memory_space<smem>>
    %c0_i32_53 = arith.constant 0 : i32
    %108 = arith.addi %107, %c0_i32_53 : i32
    %c1_i32_54 = arith.constant 1 : i32
    %109 = vector.broadcast %c1_i32_54 : i32 to vector<8x128xi32>
    %110 = arith.cmpi eq, %1, %109 : vector<8x128xi32>
    %111 = vector.broadcast %108 : i32 to vector<8x128xi32>
    %112 = arith.cmpi eq, %0, %111 : vector<8x128xi32>
    %113 = arith.andi %110, %112 : vector<8x128xi1>
    %cst_55 = arith.constant 1.000000e+00 : f32
    %114 = vector.broadcast %cst_55 : f32 to vector<8x128xf32>
    %115 = arith.select %113, %114, %106 : vector<8x128xi1>, vector<8x128xf32>
    %cst_56 = arith.constant 0.000000e+00 : f32
    %116 = vector.broadcast %cst_56 : f32 to vector<8x128xf32>
    %c6 = arith.constant 6 : index
    %c0_57 = arith.constant 0 : index
    %117 = memref.load %arg0[%c6, %c0_57] : memref<8x2xi32, #tpu.memory_space<smem>>
    %c0_i32_58 = arith.constant 0 : i32
    %118 = arith.addi %117, %c0_i32_58 : i32
    %c0_i32_59 = arith.constant 0 : i32
    %119 = vector.broadcast %c0_i32_59 : i32 to vector<8x128xi32>
    %120 = arith.cmpi eq, %1, %119 : vector<8x128xi32>
    %121 = vector.broadcast %118 : i32 to vector<8x128xi32>
    %122 = arith.cmpi eq, %0, %121 : vector<8x128xi32>
    %123 = arith.andi %120, %122 : vector<8x128xi1>
    %cst_60 = arith.constant 1.000000e+00 : f32
    %124 = vector.broadcast %cst_60 : f32 to vector<8x128xf32>
    %125 = arith.select %123, %124, %116 : vector<8x128xi1>, vector<8x128xf32>
    %c6_61 = arith.constant 6 : index
    %c1_62 = arith.constant 1 : index
    %126 = memref.load %arg0[%c6_61, %c1_62] : memref<8x2xi32, #tpu.memory_space<smem>>
    %c0_i32_63 = arith.constant 0 : i32
    %127 = arith.addi %126, %c0_i32_63 : i32
    %c1_i32_64 = arith.constant 1 : i32
    %128 = vector.broadcast %c1_i32_64 : i32 to vector<8x128xi32>
    %129 = arith.cmpi eq, %1, %128 : vector<8x128xi32>
    %130 = vector.broadcast %127 : i32 to vector<8x128xi32>
    %131 = arith.cmpi eq, %0, %130 : vector<8x128xi32>
    %132 = arith.andi %129, %131 : vector<8x128xi1>
    %cst_65 = arith.constant 1.000000e+00 : f32
    %133 = vector.broadcast %cst_65 : f32 to vector<8x128xf32>
    %134 = arith.select %132, %133, %125 : vector<8x128xi1>, vector<8x128xf32>
    %cst_66 = arith.constant 0.000000e+00 : f32
    %135 = vector.broadcast %cst_66 : f32 to vector<8x128xf32>
    %c7 = arith.constant 7 : index
    %c0_67 = arith.constant 0 : index
    %136 = memref.load %arg0[%c7, %c0_67] : memref<8x2xi32, #tpu.memory_space<smem>>
    %c0_i32_68 = arith.constant 0 : i32
    %137 = arith.addi %136, %c0_i32_68 : i32
    %c0_i32_69 = arith.constant 0 : i32
    %138 = vector.broadcast %c0_i32_69 : i32 to vector<8x128xi32>
    %139 = arith.cmpi eq, %1, %138 : vector<8x128xi32>
    %140 = vector.broadcast %137 : i32 to vector<8x128xi32>
    %141 = arith.cmpi eq, %0, %140 : vector<8x128xi32>
    %142 = arith.andi %139, %141 : vector<8x128xi1>
    %cst_70 = arith.constant 1.000000e+00 : f32
    %143 = vector.broadcast %cst_70 : f32 to vector<8x128xf32>
    %144 = arith.select %142, %143, %135 : vector<8x128xi1>, vector<8x128xf32>
    %c7_71 = arith.constant 7 : index
    %c1_72 = arith.constant 1 : index
    %145 = memref.load %arg0[%c7_71, %c1_72] : memref<8x2xi32, #tpu.memory_space<smem>>
    %c0_i32_73 = arith.constant 0 : i32
    %146 = arith.addi %145, %c0_i32_73 : i32
    %c1_i32_74 = arith.constant 1 : i32
    %147 = vector.broadcast %c1_i32_74 : i32 to vector<8x128xi32>
    %148 = arith.cmpi eq, %1, %147 : vector<8x128xi32>
    %149 = vector.broadcast %146 : i32 to vector<8x128xi32>
    %150 = arith.cmpi eq, %0, %149 : vector<8x128xi32>
    %151 = arith.andi %148, %150 : vector<8x128xi1>
    %cst_75 = arith.constant 1.000000e+00 : f32
    %152 = vector.broadcast %cst_75 : f32 to vector<8x128xf32>
    %153 = arith.select %151, %152, %144 : vector<8x128xi1>, vector<8x128xf32>
    %154 = tpu.concatenate %20, %39, %58, %77, %96, %115, %134, %153 in 0 : vector<8x128xf32>, vector<8x128xf32>, vector<8x128xf32>, vector<8x128xf32>, vector<8x128xf32>, vector<8x128xf32>, vector<8x128xf32>, vector<8x128xf32> -> vector<64x128xf32>
    %c0_76 = arith.constant 0 : index
    %c0_77 = arith.constant 0 : index
    %155 = vector.load %arg3[%c0_76, %c0_77] : memref<128x32xf32, #tpu.memory_space<vmem>>, vector<128x32xf32>
    %cst_78 = arith.constant dense<0.000000e+00> : vector<64x32xf32>
    %156 = tpu.matmul %154, %155, %cst_78 {dimension_numbers = #tpu.dot_dimension_numbers<[1], [0], [0], [1], [0, 0, 1, 1], [], []>} : vector<64x128xf32>, vector<128x32xf32>, vector<64x32xf32> -> vector<64x32xf32>
    %c0_79 = arith.constant 0 : index
    %c0_80 = arith.constant 0 : index
    %157 = vector.load %arg4[%c0_79, %c0_80] : memref<32x128xf32, #tpu.memory_space<vmem>>, vector<32x128xf32>
    %cst_81 = arith.constant dense<0.000000e+00> : vector<64x128xf32>
    %158 = tpu.matmul %156, %157, %cst_81 {dimension_numbers = #tpu.dot_dimension_numbers<[1], [0], [0], [1], [0, 0, 1, 1], [], []>} : vector<64x32xf32>, vector<32x128xf32>, vector<64x128xf32> -> vector<64x128xf32>
    %c0_82 = arith.constant 0 : index
    %c0_83 = arith.constant 0 : index
    %159 = vector.load %arg6[%c0_82, %c0_83] : memref<1x128xf32, #tpu.memory_space<vmem>>, vector<1x128xf32>
    %160 = vector.broadcast %159 : vector<1x128xf32> to vector<64x128xf32>
    %161 = arith.addf %158, %160 : vector<64x128xf32>
    %c0_84 = arith.constant 0 : index
    %c0_85 = arith.constant 0 : index
    %162 = vector.load %arg5[%c0_84, %c0_85] : memref<32x128xf32, #tpu.memory_space<vmem>>, vector<32x128xf32>
    %c0_86 = arith.constant 0 : index
    %c0_87 = arith.constant 0 : index
    %163 = vector.load %arg7[%c0_86, %c0_87] : memref<32x128xf32, #tpu.memory_space<vmem>>, vector<32x128xf32>
    %c0_88 = arith.constant 0 : index
    %c0_89 = arith.constant 0 : index
    %164 = vector.load %arg8[%c0_88, %c0_89] : memref<32x128xf32, #tpu.memory_space<vmem>>, vector<32x128xf32>
    %c0_90 = arith.constant 0 : index
    %c0_91 = arith.constant 0 : index
    %165 = vector.load %arg9[%c0_90, %c0_91] : memref<1x128xf32, #tpu.memory_space<vmem>>, vector<1x128xf32>
    %166 = vector.shape_cast %165 : vector<1x128xf32> to vector<1x128xf32>
    %167 = vector.broadcast %166 : vector<1x128xf32> to vector<8x128xf32>
    %168 = tpu.iota {dimensions = array<i32: 1>} : vector<8x128xi32>
    %c96_i32 = arith.constant 96 : i32
    %169 = vector.broadcast %c96_i32 : i32 to vector<8x128xi32>
    %170 = arith.cmpi slt, %168, %169 : vector<8x128xi32>
    %c0_92 = arith.constant 0 : index
    %c0_93 = arith.constant 0 : index
    %c0_94 = arith.constant 0 : index
    %171 = vector.load %arg1[%c0_92, %c0_93, %c0_94] : memref<2x8x32xf32, #tpu.memory_space<vmem>>, vector<1x8x32xf32>
    %172 = vector.shape_cast %171 : vector<1x8x32xf32> to vector<8x32xf32>
    %c0_95 = arith.constant 0 : index
    %c0_96 = arith.constant 0 : index
    %c0_97 = arith.constant 0 : index
    %173 = vector.load %arg2[%c0_95, %c0_96, %c0_97] : memref<2x8x32xf32, #tpu.memory_space<vmem>>, vector<1x8x32xf32>
    %174 = vector.shape_cast %173 : vector<1x8x32xf32> to vector<8x32xf32>
    %c1_98 = arith.constant 1 : index
    %c0_99 = arith.constant 0 : index
    %c0_100 = arith.constant 0 : index
    %175 = vector.load %arg1[%c1_98, %c0_99, %c0_100] : memref<2x8x32xf32, #tpu.memory_space<vmem>>, vector<1x8x32xf32>
    %176 = vector.shape_cast %175 : vector<1x8x32xf32> to vector<8x32xf32>
    %c1_101 = arith.constant 1 : index
    %c0_102 = arith.constant 0 : index
    %c0_103 = arith.constant 0 : index
    %177 = vector.load %arg2[%c1_101, %c0_102, %c0_103] : memref<2x8x32xf32, #tpu.memory_space<vmem>>, vector<1x8x32xf32>
    %178 = vector.shape_cast %177 : vector<1x8x32xf32> to vector<8x32xf32>
    %cst_104 = arith.constant dense<0.000000e+00> : vector<8x128xf32>
    %179 = tpu.matmul %172, %162, %cst_104 {dimension_numbers = #tpu.dot_dimension_numbers<[1], [0], [0], [1], [0, 0, 1, 1], [], []>} : vector<8x32xf32>, vector<32x128xf32>, vector<8x128xf32> -> vector<8x128xf32>
    %cst_105 = arith.constant dense<0.000000e+00> : vector<8x128xf32>
    %180 = tpu.matmul %176, %164, %cst_105 {dimension_numbers = #tpu.dot_dimension_numbers<[1], [0], [0], [1], [0, 0, 1, 1], [], []>} : vector<8x32xf32>, vector<32x128xf32>, vector<8x128xf32> -> vector<8x128xf32>
    %181 = vector.extract_strided_slice %161 {offsets = [0, 0], sizes = [8, 128], strides = [1, 1]} : vector<64x128xf32> to vector<8x128xf32>
    %182 = arith.addf %181, %179 : vector<8x128xf32>
    %cst_106 = arith.constant 2.000000e+00 : f32
    %183 = vector.broadcast %cst_106 : f32 to vector<8x128xf32>
    %184 = arith.mulf %183, %182 : vector<8x128xf32>
    %185 = arith.select %170, %182, %184 : vector<8x128xi1>, vector<8x128xf32>
    %186 = arith.negf %185 : vector<8x128xf32>
    %187 = math.exp %186 : vector<8x128xf32>
    %cst_107 = arith.constant 1.000000e+00 : f32
    %188 = vector.broadcast %cst_107 : f32 to vector<8x128xf32>
    %189 = arith.addf %188, %187 : vector<8x128xf32>
    %190 = arith.divf %188, %189 : vector<8x128xf32>
    %cst_108 = arith.constant 2.000000e+00 : f32
    %191 = vector.broadcast %cst_108 : f32 to vector<8x128xf32>
    %192 = arith.mulf %191, %190 : vector<8x128xf32>
    %cst_109 = arith.constant 1.000000e+00 : f32
    %193 = vector.broadcast %cst_109 : f32 to vector<8x128xf32>
    %194 = arith.subf %192, %193 : vector<8x128xf32>
    %195 = arith.select %170, %190, %194 : vector<8x128xi1>, vector<8x128xf32>
    %196 = vector.extract_strided_slice %195 {offsets = [0, 0], sizes = [8, 32], strides = [1, 1]} : vector<8x128xf32> to vector<8x32xf32>
    %197 = vector.extract_strided_slice %195 {offsets = [0, 32], sizes = [8, 32], strides = [1, 1]} : vector<8x128xf32> to vector<8x32xf32>
    %198 = vector.extract_strided_slice %195 {offsets = [0, 64], sizes = [8, 32], strides = [1, 1]} : vector<8x128xf32> to vector<8x32xf32>
    %199 = vector.extract_strided_slice %195 {offsets = [0, 96], sizes = [8, 32], strides = [1, 1]} : vector<8x128xf32> to vector<8x32xf32>
    %200 = arith.mulf %197, %174 : vector<8x32xf32>
    %201 = arith.mulf %196, %199 : vector<8x32xf32>
    %202 = arith.addf %200, %201 : vector<8x32xf32>
    %203 = math.tanh %202 : vector<8x32xf32>
    %204 = arith.mulf %198, %203 : vector<8x32xf32>
    %cst_110 = arith.constant dense<0.000000e+00> : vector<8x128xf32>
    %205 = tpu.matmul %204, %163, %cst_110 {dimension_numbers = #tpu.dot_dimension_numbers<[1], [0], [0], [1], [0, 0, 1, 1], [], []>} : vector<8x32xf32>, vector<32x128xf32>, vector<8x128xf32> -> vector<8x128xf32>
    %206 = arith.addf %205, %180 : vector<8x128xf32>
    %207 = arith.addf %206, %167 : vector<8x128xf32>
    %cst_111 = arith.constant 2.000000e+00 : f32
    %208 = vector.broadcast %cst_111 : f32 to vector<8x128xf32>
    %209 = arith.mulf %208, %207 : vector<8x128xf32>
    %210 = arith.select %170, %207, %209 : vector<8x128xi1>, vector<8x128xf32>
    %211 = arith.negf %210 : vector<8x128xf32>
    %212 = math.exp %211 : vector<8x128xf32>
    %cst_112 = arith.constant 1.000000e+00 : f32
    %213 = vector.broadcast %cst_112 : f32 to vector<8x128xf32>
    %214 = arith.addf %213, %212 : vector<8x128xf32>
    %215 = arith.divf %213, %214 : vector<8x128xf32>
    %cst_113 = arith.constant 2.000000e+00 : f32
    %216 = vector.broadcast %cst_113 : f32 to vector<8x128xf32>
    %217 = arith.mulf %216, %215 : vector<8x128xf32>
    %cst_114 = arith.constant 1.000000e+00 : f32
    %218 = vector.broadcast %cst_114 : f32 to vector<8x128xf32>
    %219 = arith.subf %217, %218 : vector<8x128xf32>
    %220 = arith.select %170, %215, %219 : vector<8x128xi1>, vector<8x128xf32>
    %221 = vector.extract_strided_slice %220 {offsets = [0, 0], sizes = [8, 32], strides = [1, 1]} : vector<8x128xf32> to vector<8x32xf32>
    %222 = vector.extract_strided_slice %220 {offsets = [0, 32], sizes = [8, 32], strides = [1, 1]} : vector<8x128xf32> to vector<8x32xf32>
    %223 = vector.extract_strided_slice %220 {offsets = [0, 64], sizes = [8, 32], strides = [1, 1]} : vector<8x128xf32> to vector<8x32xf32>
    %224 = vector.extract_strided_slice %220 {offsets = [0, 96], sizes = [8, 32], strides = [1, 1]} : vector<8x128xf32> to vector<8x32xf32>
    %225 = arith.mulf %222, %178 : vector<8x32xf32>
    %226 = arith.mulf %221, %224 : vector<8x32xf32>
    %227 = arith.addf %225, %226 : vector<8x32xf32>
    %228 = math.tanh %227 : vector<8x32xf32>
    %229 = arith.mulf %223, %228 : vector<8x32xf32>
    %c0_115 = arith.constant 0 : index
    %c0_116 = arith.constant 0 : index
    %230 = vector.load %arg15[%c0_115, %c0_116] : memref<64x32xf32, #tpu.memory_space<vmem>>, vector<8x32xf32>
    tpu.vector_store %arg15[%c0_115, %c0_116], %229 {strides = array<i32>} : memref<64x32xf32, #tpu.memory_space<vmem>>, vector<8x32xf32>,
    %cst_117 = arith.constant dense<0.000000e+00> : vector<8x128xf32>
    %231 = tpu.matmul %204, %162, %cst_117 {dimension_numbers = #tpu.dot_dimension_numbers<[1], [0], [0], [1], [0, 0, 1, 1], [], []>} : vector<8x32xf32>, vector<32x128xf32>, vector<8x128xf32> -> vector<8x128xf32>
    %cst_118 = arith.constant dense<0.000000e+00> : vector<8x128xf32>
    %232 = tpu.matmul %229, %164, %cst_118 {dimension_numbers = #tpu.dot_dimension_numbers<[1], [0], [0], [1], [0, 0, 1, 1], [], []>} : vector<8x32xf32>, vector<32x128xf32>, vector<8x128xf32> -> vector<8x128xf32>
    %233 = vector.extract_strided_slice %161 {offsets = [8, 0], sizes = [8, 128], strides = [1, 1]} : vector<64x128xf32> to vector<8x128xf32>
    %234 = arith.addf %233, %231 : vector<8x128xf32>
    %cst_119 = arith.constant 2.000000e+00 : f32
    %235 = vector.broadcast %cst_119 : f32 to vector<8x128xf32>
    %236 = arith.mulf %235, %234 : vector<8x128xf32>
    %237 = arith.select %170, %234, %236 : vector<8x128xi1>, vector<8x128xf32>
    %238 = arith.negf %237 : vector<8x128xf32>
    %239 = math.exp %238 : vector<8x128xf32>
    %cst_120 = arith.constant 1.000000e+00 : f32
    %240 = vector.broadcast %cst_120 : f32 to vector<8x128xf32>
    %241 = arith.addf %240, %239 : vector<8x128xf32>
    %242 = arith.divf %240, %241 : vector<8x128xf32>
    %cst_121 = arith.constant 2.000000e+00 : f32
    %243 = vector.broadcast %cst_121 : f32 to vector<8x128xf32>
    %244 = arith.mulf %243, %242 : vector<8x128xf32>
    %cst_122 = arith.constant 1.000000e+00 : f32
    %245 = vector.broadcast %cst_122 : f32 to vector<8x128xf32>
    %246 = arith.subf %244, %245 : vector<8x128xf32>
    %247 = arith.select %170, %242, %246 : vector<8x128xi1>, vector<8x128xf32>
    %248 = vector.extract_strided_slice %247 {offsets = [0, 0], sizes = [8, 32], strides = [1, 1]} : vector<8x128xf32> to vector<8x32xf32>
    %249 = vector.extract_strided_slice %247 {offsets = [0, 32], sizes = [8, 32], strides = [1, 1]} : vector<8x128xf32> to vector<8x32xf32>
    %250 = vector.extract_strided_slice %247 {offsets = [0, 64], sizes = [8, 32], strides = [1, 1]} : vector<8x128xf32> to vector<8x32xf32>
    %251 = vector.extract_strided_slice %247 {offsets = [0, 96], sizes = [8, 32], strides = [1, 1]} : vector<8x128xf32> to vector<8x32xf32>
    %252 = arith.mulf %249, %202 : vector<8x32xf32>
    %253 = arith.mulf %248, %251 : vector<8x32xf32>
    %254 = arith.addf %252, %253 : vector<8x32xf32>
    %255 = math.tanh %254 : vector<8x32xf32>
    %256 = arith.mulf %250, %255 : vector<8x32xf32>
    %cst_123 = arith.constant dense<0.000000e+00> : vector<8x128xf32>
    %257 = tpu.matmul %256, %163, %cst_123 {dimension_numbers = #tpu.dot_dimension_numbers<[1], [0], [0], [1], [0, 0, 1, 1], [], []>} : vector<8x32xf32>, vector<32x128xf32>, vector<8x128xf32> -> vector<8x128xf32>
    %258 = arith.addf %257, %232 : vector<8x128xf32>
    %259 = arith.addf %258, %167 : vector<8x128xf32>
    %cst_124 = arith.constant 2.000000e+00 : f32
    %260 = vector.broadcast %cst_124 : f32 to vector<8x128xf32>
    %261 = arith.mulf %260, %259 : vector<8x128xf32>
    %262 = arith.select %170, %259, %261 : vector<8x128xi1>, vector<8x128xf32>
    %263 = arith.negf %262 : vector<8x128xf32>
    %264 = math.exp %263 : vector<8x128xf32>
    %cst_125 = arith.constant 1.000000e+00 : f32
    %265 = vector.broadcast %cst_125 : f32 to vector<8x128xf32>
    %266 = arith.addf %265, %264 : vector<8x128xf32>
    %267 = arith.divf %265, %266 : vector<8x128xf32>
    %cst_126 = arith.constant 2.000000e+00 : f32
    %268 = vector.broadcast %cst_126 : f32 to vector<8x128xf32>
    %269 = arith.mulf %268, %267 : vector<8x128xf32>
    %cst_127 = arith.constant 1.000000e+00 : f32
    %270 = vector.broadcast %cst_127 : f32 to vector<8x128xf32>
    %271 = arith.subf %269, %270 : vector<8x128xf32>
    %272 = arith.select %170, %267, %271 : vector<8x128xi1>, vector<8x128xf32>
    %273 = vector.extract_strided_slice %272 {offsets = [0, 0], sizes = [8, 32], strides = [1, 1]} : vector<8x128xf32> to vector<8x32xf32>
    %274 = vector.extract_strided_slice %272 {offsets = [0, 32], sizes = [8, 32], strides = [1, 1]} : vector<8x128xf32> to vector<8x32xf32>
    %275 = vector.extract_strided_slice %272 {offsets = [0, 64], sizes = [8, 32], strides = [1, 1]} : vector<8x128xf32> to vector<8x32xf32>
    %276 = vector.extract_strided_slice %272 {offsets = [0, 96], sizes = [8, 32], strides = [1, 1]} : vector<8x128xf32> to vector<8x32xf32>
    %277 = arith.mulf %274, %227 : vector<8x32xf32>
    %278 = arith.mulf %273, %276 : vector<8x32xf32>
    %279 = arith.addf %277, %278 : vector<8x32xf32>
    %280 = math.tanh %279 : vector<8x32xf32>
    %281 = arith.mulf %275, %280 : vector<8x32xf32>
    %c8 = arith.constant 8 : index
    %c0_128 = arith.constant 0 : index
    %282 = vector.load %arg15[%c8, %c0_128] : memref<64x32xf32, #tpu.memory_space<vmem>>, vector<8x32xf32>
    tpu.vector_store %arg15[%c8, %c0_128], %281 {strides = array<i32>} : memref<64x32xf32, #tpu.memory_space<vmem>>, vector<8x32xf32>,
    %cst_129 = arith.constant dense<0.000000e+00> : vector<8x128xf32>
    %283 = tpu.matmul %256, %162, %cst_129 {dimension_numbers = #tpu.dot_dimension_numbers<[1], [0], [0], [1], [0, 0, 1, 1], [], []>} : vector<8x32xf32>, vector<32x128xf32>, vector<8x128xf32> -> vector<8x128xf32>
    %cst_130 = arith.constant dense<0.000000e+00> : vector<8x128xf32>
    %284 = tpu.matmul %281, %164, %cst_130 {dimension_numbers = #tpu.dot_dimension_numbers<[1], [0], [0], [1], [0, 0, 1, 1], [], []>} : vector<8x32xf32>, vector<32x128xf32>, vector<8x128xf32> -> vector<8x128xf32>
    %285 = vector.extract_strided_slice %161 {offsets = [16, 0], sizes = [8, 128], strides = [1, 1]} : vector<64x128xf32> to vector<8x128xf32>
    %286 = arith.addf %285, %283 : vector<8x128xf32>
    %cst_131 = arith.constant 2.000000e+00 : f32
    %287 = vector.broadcast %cst_131 : f32 to vector<8x128xf32>
    %288 = arith.mulf %287, %286 : vector<8x128xf32>
    %289 = arith.select %170, %286, %288 : vector<8x128xi1>, vector<8x128xf32>
    %290 = arith.negf %289 : vector<8x128xf32>
    %291 = math.exp %290 : vector<8x128xf32>
    %cst_132 = arith.constant 1.000000e+00 : f32
    %292 = vector.broadcast %cst_132 : f32 to vector<8x128xf32>
    %293 = arith.addf %292, %291 : vector<8x128xf32>
    %294 = arith.divf %292, %293 : vector<8x128xf32>
    %cst_133 = arith.constant 2.000000e+00 : f32
    %295 = vector.broadcast %cst_133 : f32 to vector<8x128xf32>
    %296 = arith.mulf %295, %294 : vector<8x128xf32>
    %cst_134 = arith.constant 1.000000e+00 : f32
    %297 = vector.broadcast %cst_134 : f32 to vector<8x128xf32>
    %298 = arith.subf %296, %297 : vector<8x128xf32>
    %299 = arith.select %170, %294, %298 : vector<8x128xi1>, vector<8x128xf32>
    %300 = vector.extract_strided_slice %299 {offsets = [0, 0], sizes = [8, 32], strides = [1, 1]} : vector<8x128xf32> to vector<8x32xf32>
    %301 = vector.extract_strided_slice %299 {offsets = [0, 32], sizes = [8, 32], strides = [1, 1]} : vector<8x128xf32> to vector<8x32xf32>
    %302 = vector.extract_strided_slice %299 {offsets = [0, 64], sizes = [8, 32], strides = [1, 1]} : vector<8x128xf32> to vector<8x32xf32>
    %303 = vector.extract_strided_slice %299 {offsets = [0, 96], sizes = [8, 32], strides = [1, 1]} : vector<8x128xf32> to vector<8x32xf32>
    %304 = arith.mulf %301, %254 : vector<8x32xf32>
    %305 = arith.mulf %300, %303 : vector<8x32xf32>
    %306 = arith.addf %304, %305 : vector<8x32xf32>
    %307 = math.tanh %306 : vector<8x32xf32>
    %308 = arith.mulf %302, %307 : vector<8x32xf32>
    %cst_135 = arith.constant dense<0.000000e+00> : vector<8x128xf32>
    %309 = tpu.matmul %308, %163, %cst_135 {dimension_numbers = #tpu.dot_dimension_numbers<[1], [0], [0], [1], [0, 0, 1, 1], [], []>} : vector<8x32xf32>, vector<32x128xf32>, vector<8x128xf32> -> vector<8x128xf32>
    %310 = arith.addf %309, %284 : vector<8x128xf32>
    %311 = arith.addf %310, %167 : vector<8x128xf32>
    %cst_136 = arith.constant 2.000000e+00 : f32
    %312 = vector.broadcast %cst_136 : f32 to vector<8x128xf32>
    %313 = arith.mulf %312, %311 : vector<8x128xf32>
    %314 = arith.select %170, %311, %313 : vector<8x128xi1>, vector<8x128xf32>
    %315 = arith.negf %314 : vector<8x128xf32>
    %316 = math.exp %315 : vector<8x128xf32>
    %cst_137 = arith.constant 1.000000e+00 : f32
    %317 = vector.broadcast %cst_137 : f32 to vector<8x128xf32>
    %318 = arith.addf %317, %316 : vector<8x128xf32>
    %319 = arith.divf %317, %318 : vector<8x128xf32>
    %cst_138 = arith.constant 2.000000e+00 : f32
    %320 = vector.broadcast %cst_138 : f32 to vector<8x128xf32>
    %321 = arith.mulf %320, %319 : vector<8x128xf32>
    %cst_139 = arith.constant 1.000000e+00 : f32
    %322 = vector.broadcast %cst_139 : f32 to vector<8x128xf32>
    %323 = arith.subf %321, %322 : vector<8x128xf32>
    %324 = arith.select %170, %319, %323 : vector<8x128xi1>, vector<8x128xf32>
    %325 = vector.extract_strided_slice %324 {offsets = [0, 0], sizes = [8, 32], strides = [1, 1]} : vector<8x128xf32> to vector<8x32xf32>
    %326 = vector.extract_strided_slice %324 {offsets = [0, 32], sizes = [8, 32], strides = [1, 1]} : vector<8x128xf32> to vector<8x32xf32>
    %327 = vector.extract_strided_slice %324 {offsets = [0, 64], sizes = [8, 32], strides = [1, 1]} : vector<8x128xf32> to vector<8x32xf32>
    %328 = vector.extract_strided_slice %324 {offsets = [0, 96], sizes = [8, 32], strides = [1, 1]} : vector<8x128xf32> to vector<8x32xf32>
    %329 = arith.mulf %326, %279 : vector<8x32xf32>
    %330 = arith.mulf %325, %328 : vector<8x32xf32>
    %331 = arith.addf %329, %330 : vector<8x32xf32>
    %332 = math.tanh %331 : vector<8x32xf32>
    %333 = arith.mulf %327, %332 : vector<8x32xf32>
    %c16 = arith.constant 16 : index
    %c0_140 = arith.constant 0 : index
    %334 = vector.load %arg15[%c16, %c0_140] : memref<64x32xf32, #tpu.memory_space<vmem>>, vector<8x32xf32>
    tpu.vector_store %arg15[%c16, %c0_140], %333 {strides = array<i32>} : memref<64x32xf32, #tpu.memory_space<vmem>>, vector<8x32xf32>,
    %cst_141 = arith.constant dense<0.000000e+00> : vector<8x128xf32>
    %335 = tpu.matmul %308, %162, %cst_141 {dimension_numbers = #tpu.dot_dimension_numbers<[1], [0], [0], [1], [0, 0, 1, 1], [], []>} : vector<8x32xf32>, vector<32x128xf32>, vector<8x128xf32> -> vector<8x128xf32>
    %cst_142 = arith.constant dense<0.000000e+00> : vector<8x128xf32>
    %336 = tpu.matmul %333, %164, %cst_142 {dimension_numbers = #tpu.dot_dimension_numbers<[1], [0], [0], [1], [0, 0, 1, 1], [], []>} : vector<8x32xf32>, vector<32x128xf32>, vector<8x128xf32> -> vector<8x128xf32>
    %337 = vector.extract_strided_slice %161 {offsets = [24, 0], sizes = [8, 128], strides = [1, 1]} : vector<64x128xf32> to vector<8x128xf32>
    %338 = arith.addf %337, %335 : vector<8x128xf32>
    %cst_143 = arith.constant 2.000000e+00 : f32
    %339 = vector.broadcast %cst_143 : f32 to vector<8x128xf32>
    %340 = arith.mulf %339, %338 : vector<8x128xf32>
    %341 = arith.select %170, %338, %340 : vector<8x128xi1>, vector<8x128xf32>
    %342 = arith.negf %341 : vector<8x128xf32>
    %343 = math.exp %342 : vector<8x128xf32>
    %cst_144 = arith.constant 1.000000e+00 : f32
    %344 = vector.broadcast %cst_144 : f32 to vector<8x128xf32>
    %345 = arith.addf %344, %343 : vector<8x128xf32>
    %346 = arith.divf %344, %345 : vector<8x128xf32>
    %cst_145 = arith.constant 2.000000e+00 : f32
    %347 = vector.broadcast %cst_145 : f32 to vector<8x128xf32>
    %348 = arith.mulf %347, %346 : vector<8x128xf32>
    %cst_146 = arith.constant 1.000000e+00 : f32
    %349 = vector.broadcast %cst_146 : f32 to vector<8x128xf32>
    %350 = arith.subf %348, %349 : vector<8x128xf32>
    %351 = arith.select %170, %346, %350 : vector<8x128xi1>, vector<8x128xf32>
    %352 = vector.extract_strided_slice %351 {offsets = [0, 0], sizes = [8, 32], strides = [1, 1]} : vector<8x128xf32> to vector<8x32xf32>
    %353 = vector.extract_strided_slice %351 {offsets = [0, 32], sizes = [8, 32], strides = [1, 1]} : vector<8x128xf32> to vector<8x32xf32>
    %354 = vector.extract_strided_slice %351 {offsets = [0, 64], sizes = [8, 32], strides = [1, 1]} : vector<8x128xf32> to vector<8x32xf32>
    %355 = vector.extract_strided_slice %351 {offsets = [0, 96], sizes = [8, 32], strides = [1, 1]} : vector<8x128xf32> to vector<8x32xf32>
    %356 = arith.mulf %353, %306 : vector<8x32xf32>
    %357 = arith.mulf %352, %355 : vector<8x32xf32>
    %358 = arith.addf %356, %357 : vector<8x32xf32>
    %359 = math.tanh %358 : vector<8x32xf32>
    %360 = arith.mulf %354, %359 : vector<8x32xf32>
    %cst_147 = arith.constant dense<0.000000e+00> : vector<8x128xf32>
    %361 = tpu.matmul %360, %163, %cst_147 {dimension_numbers = #tpu.dot_dimension_numbers<[1], [0], [0], [1], [0, 0, 1, 1], [], []>} : vector<8x32xf32>, vector<32x128xf32>, vector<8x128xf32> -> vector<8x128xf32>
    %362 = arith.addf %361, %336 : vector<8x128xf32>
    %363 = arith.addf %362, %167 : vector<8x128xf32>
    %cst_148 = arith.constant 2.000000e+00 : f32
    %364 = vector.broadcast %cst_148 : f32 to vector<8x128xf32>
    %365 = arith.mulf %364, %363 : vector<8x128xf32>
    %366 = arith.select %170, %363, %365 : vector<8x128xi1>, vector<8x128xf32>
    %367 = arith.negf %366 : vector<8x128xf32>
    %368 = math.exp %367 : vector<8x128xf32>
    %cst_149 = arith.constant 1.000000e+00 : f32
    %369 = vector.broadcast %cst_149 : f32 to vector<8x128xf32>
    %370 = arith.addf %369, %368 : vector<8x128xf32>
    %371 = arith.divf %369, %370 : vector<8x128xf32>
    %cst_150 = arith.constant 2.000000e+00 : f32
    %372 = vector.broadcast %cst_150 : f32 to vector<8x128xf32>
    %373 = arith.mulf %372, %371 : vector<8x128xf32>
    %cst_151 = arith.constant 1.000000e+00 : f32
    %374 = vector.broadcast %cst_151 : f32 to vector<8x128xf32>
    %375 = arith.subf %373, %374 : vector<8x128xf32>
    %376 = arith.select %170, %371, %375 : vector<8x128xi1>, vector<8x128xf32>
    %377 = vector.extract_strided_slice %376 {offsets = [0, 0], sizes = [8, 32], strides = [1, 1]} : vector<8x128xf32> to vector<8x32xf32>
    %378 = vector.extract_strided_slice %376 {offsets = [0, 32], sizes = [8, 32], strides = [1, 1]} : vector<8x128xf32> to vector<8x32xf32>
    %379 = vector.extract_strided_slice %376 {offsets = [0, 64], sizes = [8, 32], strides = [1, 1]} : vector<8x128xf32> to vector<8x32xf32>
    %380 = vector.extract_strided_slice %376 {offsets = [0, 96], sizes = [8, 32], strides = [1, 1]} : vector<8x128xf32> to vector<8x32xf32>
    %381 = arith.mulf %378, %331 : vector<8x32xf32>
    %382 = arith.mulf %377, %380 : vector<8x32xf32>
    %383 = arith.addf %381, %382 : vector<8x32xf32>
    %384 = math.tanh %383 : vector<8x32xf32>
    %385 = arith.mulf %379, %384 : vector<8x32xf32>
    %c24 = arith.constant 24 : index
    %c0_152 = arith.constant 0 : index
    %386 = vector.load %arg15[%c24, %c0_152] : memref<64x32xf32, #tpu.memory_space<vmem>>, vector<8x32xf32>
    tpu.vector_store %arg15[%c24, %c0_152], %385 {strides = array<i32>} : memref<64x32xf32, #tpu.memory_space<vmem>>, vector<8x32xf32>,
    %cst_153 = arith.constant dense<0.000000e+00> : vector<8x128xf32>
    %387 = tpu.matmul %360, %162, %cst_153 {dimension_numbers = #tpu.dot_dimension_numbers<[1], [0], [0], [1], [0, 0, 1, 1], [], []>} : vector<8x32xf32>, vector<32x128xf32>, vector<8x128xf32> -> vector<8x128xf32>
    %cst_154 = arith.constant dense<0.000000e+00> : vector<8x128xf32>
    %388 = tpu.matmul %385, %164, %cst_154 {dimension_numbers = #tpu.dot_dimension_numbers<[1], [0], [0], [1], [0, 0, 1, 1], [], []>} : vector<8x32xf32>, vector<32x128xf32>, vector<8x128xf32> -> vector<8x128xf32>
    %389 = vector.extract_strided_slice %161 {offsets = [32, 0], sizes = [8, 128], strides = [1, 1]} : vector<64x128xf32> to vector<8x128xf32>
    %390 = arith.addf %389, %387 : vector<8x128xf32>
    %cst_155 = arith.constant 2.000000e+00 : f32
    %391 = vector.broadcast %cst_155 : f32 to vector<8x128xf32>
    %392 = arith.mulf %391, %390 : vector<8x128xf32>
    %393 = arith.select %170, %390, %392 : vector<8x128xi1>, vector<8x128xf32>
    %394 = arith.negf %393 : vector<8x128xf32>
    %395 = math.exp %394 : vector<8x128xf32>
    %cst_156 = arith.constant 1.000000e+00 : f32
    %396 = vector.broadcast %cst_156 : f32 to vector<8x128xf32>
    %397 = arith.addf %396, %395 : vector<8x128xf32>
    %398 = arith.divf %396, %397 : vector<8x128xf32>
    %cst_157 = arith.constant 2.000000e+00 : f32
    %399 = vector.broadcast %cst_157 : f32 to vector<8x128xf32>
    %400 = arith.mulf %399, %398 : vector<8x128xf32>
    %cst_158 = arith.constant 1.000000e+00 : f32
    %401 = vector.broadcast %cst_158 : f32 to vector<8x128xf32>
    %402 = arith.subf %400, %401 : vector<8x128xf32>
    %403 = arith.select %170, %398, %402 : vector<8x128xi1>, vector<8x128xf32>
    %404 = vector.extract_strided_slice %403 {offsets = [0, 0], sizes = [8, 32], strides = [1, 1]} : vector<8x128xf32> to vector<8x32xf32>
    %405 = vector.extract_strided_slice %403 {offsets = [0, 32], sizes = [8, 32], strides = [1, 1]} : vector<8x128xf32> to vector<8x32xf32>
    %406 = vector.extract_strided_slice %403 {offsets = [0, 64], sizes = [8, 32], strides = [1, 1]} : vector<8x128xf32> to vector<8x32xf32>
    %407 = vector.extract_strided_slice %403 {offsets = [0, 96], sizes = [8, 32], strides = [1, 1]} : vector<8x128xf32> to vector<8x32xf32>
    %408 = arith.mulf %405, %358 : vector<8x32xf32>
    %409 = arith.mulf %404, %407 : vector<8x32xf32>
    %410 = arith.addf %408, %409 : vector<8x32xf32>
    %411 = math.tanh %410 : vector<8x32xf32>
    %412 = arith.mulf %406, %411 : vector<8x32xf32>
    %cst_159 = arith.constant dense<0.000000e+00> : vector<8x128xf32>
    %413 = tpu.matmul %412, %163, %cst_159 {dimension_numbers = #tpu.dot_dimension_numbers<[1], [0], [0], [1], [0, 0, 1, 1], [], []>} : vector<8x32xf32>, vector<32x128xf32>, vector<8x128xf32> -> vector<8x128xf32>
    %414 = arith.addf %413, %388 : vector<8x128xf32>
    %415 = arith.addf %414, %167 : vector<8x128xf32>
    %cst_160 = arith.constant 2.000000e+00 : f32
    %416 = vector.broadcast %cst_160 : f32 to vector<8x128xf32>
    %417 = arith.mulf %416, %415 : vector<8x128xf32>
    %418 = arith.select %170, %415, %417 : vector<8x128xi1>, vector<8x128xf32>
    %419 = arith.negf %418 : vector<8x128xf32>
    %420 = math.exp %419 : vector<8x128xf32>
    %cst_161 = arith.constant 1.000000e+00 : f32
    %421 = vector.broadcast %cst_161 : f32 to vector<8x128xf32>
    %422 = arith.addf %421, %420 : vector<8x128xf32>
    %423 = arith.divf %421, %422 : vector<8x128xf32>
    %cst_162 = arith.constant 2.000000e+00 : f32
    %424 = vector.broadcast %cst_162 : f32 to vector<8x128xf32>
    %425 = arith.mulf %424, %423 : vector<8x128xf32>
    %cst_163 = arith.constant 1.000000e+00 : f32
    %426 = vector.broadcast %cst_163 : f32 to vector<8x128xf32>
    %427 = arith.subf %425, %426 : vector<8x128xf32>
    %428 = arith.select %170, %423, %427 : vector<8x128xi1>, vector<8x128xf32>
    %429 = vector.extract_strided_slice %428 {offsets = [0, 0], sizes = [8, 32], strides = [1, 1]} : vector<8x128xf32> to vector<8x32xf32>
    %430 = vector.extract_strided_slice %428 {offsets = [0, 32], sizes = [8, 32], strides = [1, 1]} : vector<8x128xf32> to vector<8x32xf32>
    %431 = vector.extract_strided_slice %428 {offsets = [0, 64], sizes = [8, 32], strides = [1, 1]} : vector<8x128xf32> to vector<8x32xf32>
    %432 = vector.extract_strided_slice %428 {offsets = [0, 96], sizes = [8, 32], strides = [1, 1]} : vector<8x128xf32> to vector<8x32xf32>
    %433 = arith.mulf %430, %383 : vector<8x32xf32>
    %434 = arith.mulf %429, %432 : vector<8x32xf32>
    %435 = arith.addf %433, %434 : vector<8x32xf32>
    %436 = math.tanh %435 : vector<8x32xf32>
    %437 = arith.mulf %431, %436 : vector<8x32xf32>
    %c32 = arith.constant 32 : index
    %c0_164 = arith.constant 0 : index
    %438 = vector.load %arg15[%c32, %c0_164] : memref<64x32xf32, #tpu.memory_space<vmem>>, vector<8x32xf32>
    tpu.vector_store %arg15[%c32, %c0_164], %437 {strides = array<i32>} : memref<64x32xf32, #tpu.memory_space<vmem>>, vector<8x32xf32>,
    %cst_165 = arith.constant dense<0.000000e+00> : vector<8x128xf32>
    %439 = tpu.matmul %412, %162, %cst_165 {dimension_numbers = #tpu.dot_dimension_numbers<[1], [0], [0], [1], [0, 0, 1, 1], [], []>} : vector<8x32xf32>, vector<32x128xf32>, vector<8x128xf32> -> vector<8x128xf32>
    %cst_166 = arith.constant dense<0.000000e+00> : vector<8x128xf32>
    %440 = tpu.matmul %437, %164, %cst_166 {dimension_numbers = #tpu.dot_dimension_numbers<[1], [0], [0], [1], [0, 0, 1, 1], [], []>} : vector<8x32xf32>, vector<32x128xf32>, vector<8x128xf32> -> vector<8x128xf32>
    %441 = vector.extract_strided_slice %161 {offsets = [40, 0], sizes = [8, 128], strides = [1, 1]} : vector<64x128xf32> to vector<8x128xf32>
    %442 = arith.addf %441, %439 : vector<8x128xf32>
    %cst_167 = arith.constant 2.000000e+00 : f32
    %443 = vector.broadcast %cst_167 : f32 to vector<8x128xf32>
    %444 = arith.mulf %443, %442 : vector<8x128xf32>
    %445 = arith.select %170, %442, %444 : vector<8x128xi1>, vector<8x128xf32>
    %446 = arith.negf %445 : vector<8x128xf32>
    %447 = math.exp %446 : vector<8x128xf32>
    %cst_168 = arith.constant 1.000000e+00 : f32
    %448 = vector.broadcast %cst_168 : f32 to vector<8x128xf32>
    %449 = arith.addf %448, %447 : vector<8x128xf32>
    %450 = arith.divf %448, %449 : vector<8x128xf32>
    %cst_169 = arith.constant 2.000000e+00 : f32
    %451 = vector.broadcast %cst_169 : f32 to vector<8x128xf32>
    %452 = arith.mulf %451, %450 : vector<8x128xf32>
    %cst_170 = arith.constant 1.000000e+00 : f32
    %453 = vector.broadcast %cst_170 : f32 to vector<8x128xf32>
    %454 = arith.subf %452, %453 : vector<8x128xf32>
    %455 = arith.select %170, %450, %454 : vector<8x128xi1>, vector<8x128xf32>
    %456 = vector.extract_strided_slice %455 {offsets = [0, 0], sizes = [8, 32], strides = [1, 1]} : vector<8x128xf32> to vector<8x32xf32>
    %457 = vector.extract_strided_slice %455 {offsets = [0, 32], sizes = [8, 32], strides = [1, 1]} : vector<8x128xf32> to vector<8x32xf32>
    %458 = vector.extract_strided_slice %455 {offsets = [0, 64], sizes = [8, 32], strides = [1, 1]} : vector<8x128xf32> to vector<8x32xf32>
    %459 = vector.extract_strided_slice %455 {offsets = [0, 96], sizes = [8, 32], strides = [1, 1]} : vector<8x128xf32> to vector<8x32xf32>
    %460 = arith.mulf %457, %410 : vector<8x32xf32>
    %461 = arith.mulf %456, %459 : vector<8x32xf32>
    %462 = arith.addf %460, %461 : vector<8x32xf32>
    %463 = math.tanh %462 : vector<8x32xf32>
    %464 = arith.mulf %458, %463 : vector<8x32xf32>
    %cst_171 = arith.constant dense<0.000000e+00> : vector<8x128xf32>
    %465 = tpu.matmul %464, %163, %cst_171 {dimension_numbers = #tpu.dot_dimension_numbers<[1], [0], [0], [1], [0, 0, 1, 1], [], []>} : vector<8x32xf32>, vector<32x128xf32>, vector<8x128xf32> -> vector<8x128xf32>
    %466 = arith.addf %465, %440 : vector<8x128xf32>
    %467 = arith.addf %466, %167 : vector<8x128xf32>
    %cst_172 = arith.constant 2.000000e+00 : f32
    %468 = vector.broadcast %cst_172 : f32 to vector<8x128xf32>
    %469 = arith.mulf %468, %467 : vector<8x128xf32>
    %470 = arith.select %170, %467, %469 : vector<8x128xi1>, vector<8x128xf32>
    %471 = arith.negf %470 : vector<8x128xf32>
    %472 = math.exp %471 : vector<8x128xf32>
    %cst_173 = arith.constant 1.000000e+00 : f32
    %473 = vector.broadcast %cst_173 : f32 to vector<8x128xf32>
    %474 = arith.addf %473, %472 : vector<8x128xf32>
    %475 = arith.divf %473, %474 : vector<8x128xf32>
    %cst_174 = arith.constant 2.000000e+00 : f32
    %476 = vector.broadcast %cst_174 : f32 to vector<8x128xf32>
    %477 = arith.mulf %476, %475 : vector<8x128xf32>
    %cst_175 = arith.constant 1.000000e+00 : f32
    %478 = vector.broadcast %cst_175 : f32 to vector<8x128xf32>
    %479 = arith.subf %477, %478 : vector<8x128xf32>
    %480 = arith.select %170, %475, %479 : vector<8x128xi1>, vector<8x128xf32>
    %481 = vector.extract_strided_slice %480 {offsets = [0, 0], sizes = [8, 32], strides = [1, 1]} : vector<8x128xf32> to vector<8x32xf32>
    %482 = vector.extract_strided_slice %480 {offsets = [0, 32], sizes = [8, 32], strides = [1, 1]} : vector<8x128xf32> to vector<8x32xf32>
    %483 = vector.extract_strided_slice %480 {offsets = [0, 64], sizes = [8, 32], strides = [1, 1]} : vector<8x128xf32> to vector<8x32xf32>
    %484 = vector.extract_strided_slice %480 {offsets = [0, 96], sizes = [8, 32], strides = [1, 1]} : vector<8x128xf32> to vector<8x32xf32>
    %485 = arith.mulf %482, %435 : vector<8x32xf32>
    %486 = arith.mulf %481, %484 : vector<8x32xf32>
    %487 = arith.addf %485, %486 : vector<8x32xf32>
    %488 = math.tanh %487 : vector<8x32xf32>
    %489 = arith.mulf %483, %488 : vector<8x32xf32>
    %c40 = arith.constant 40 : index
    %c0_176 = arith.constant 0 : index
    %490 = vector.load %arg15[%c40, %c0_176] : memref<64x32xf32, #tpu.memory_space<vmem>>, vector<8x32xf32>
    tpu.vector_store %arg15[%c40, %c0_176], %489 {strides = array<i32>} : memref<64x32xf32, #tpu.memory_space<vmem>>, vector<8x32xf32>,
    %cst_177 = arith.constant dense<0.000000e+00> : vector<8x128xf32>
    %491 = tpu.matmul %464, %162, %cst_177 {dimension_numbers = #tpu.dot_dimension_numbers<[1], [0], [0], [1], [0, 0, 1, 1], [], []>} : vector<8x32xf32>, vector<32x128xf32>, vector<8x128xf32> -> vector<8x128xf32>
    %cst_178 = arith.constant dense<0.000000e+00> : vector<8x128xf32>
    %492 = tpu.matmul %489, %164, %cst_178 {dimension_numbers = #tpu.dot_dimension_numbers<[1], [0], [0], [1], [0, 0, 1, 1], [], []>} : vector<8x32xf32>, vector<32x128xf32>, vector<8x128xf32> -> vector<8x128xf32>
    %493 = vector.extract_strided_slice %161 {offsets = [48, 0], sizes = [8, 128], strides = [1, 1]} : vector<64x128xf32> to vector<8x128xf32>
    %494 = arith.addf %493, %491 : vector<8x128xf32>
    %cst_179 = arith.constant 2.000000e+00 : f32
    %495 = vector.broadcast %cst_179 : f32 to vector<8x128xf32>
    %496 = arith.mulf %495, %494 : vector<8x128xf32>
    %497 = arith.select %170, %494, %496 : vector<8x128xi1>, vector<8x128xf32>
    %498 = arith.negf %497 : vector<8x128xf32>
    %499 = math.exp %498 : vector<8x128xf32>
    %cst_180 = arith.constant 1.000000e+00 : f32
    %500 = vector.broadcast %cst_180 : f32 to vector<8x128xf32>
    %501 = arith.addf %500, %499 : vector<8x128xf32>
    %502 = arith.divf %500, %501 : vector<8x128xf32>
    %cst_181 = arith.constant 2.000000e+00 : f32
    %503 = vector.broadcast %cst_181 : f32 to vector<8x128xf32>
    %504 = arith.mulf %503, %502 : vector<8x128xf32>
    %cst_182 = arith.constant 1.000000e+00 : f32
    %505 = vector.broadcast %cst_182 : f32 to vector<8x128xf32>
    %506 = arith.subf %504, %505 : vector<8x128xf32>
    %507 = arith.select %170, %502, %506 : vector<8x128xi1>, vector<8x128xf32>
    %508 = vector.extract_strided_slice %507 {offsets = [0, 0], sizes = [8, 32], strides = [1, 1]} : vector<8x128xf32> to vector<8x32xf32>
    %509 = vector.extract_strided_slice %507 {offsets = [0, 32], sizes = [8, 32], strides = [1, 1]} : vector<8x128xf32> to vector<8x32xf32>
    %510 = vector.extract_strided_slice %507 {offsets = [0, 64], sizes = [8, 32], strides = [1, 1]} : vector<8x128xf32> to vector<8x32xf32>
    %511 = vector.extract_strided_slice %507 {offsets = [0, 96], sizes = [8, 32], strides = [1, 1]} : vector<8x128xf32> to vector<8x32xf32>
    %512 = arith.mulf %509, %462 : vector<8x32xf32>
    %513 = arith.mulf %508, %511 : vector<8x32xf32>
    %514 = arith.addf %512, %513 : vector<8x32xf32>
    %515 = math.tanh %514 : vector<8x32xf32>
    %516 = arith.mulf %510, %515 : vector<8x32xf32>
    %cst_183 = arith.constant dense<0.000000e+00> : vector<8x128xf32>
    %517 = tpu.matmul %516, %163, %cst_183 {dimension_numbers = #tpu.dot_dimension_numbers<[1], [0], [0], [1], [0, 0, 1, 1], [], []>} : vector<8x32xf32>, vector<32x128xf32>, vector<8x128xf32> -> vector<8x128xf32>
    %518 = arith.addf %517, %492 : vector<8x128xf32>
    %519 = arith.addf %518, %167 : vector<8x128xf32>
    %cst_184 = arith.constant 2.000000e+00 : f32
    %520 = vector.broadcast %cst_184 : f32 to vector<8x128xf32>
    %521 = arith.mulf %520, %519 : vector<8x128xf32>
    %522 = arith.select %170, %519, %521 : vector<8x128xi1>, vector<8x128xf32>
    %523 = arith.negf %522 : vector<8x128xf32>
    %524 = math.exp %523 : vector<8x128xf32>
    %cst_185 = arith.constant 1.000000e+00 : f32
    %525 = vector.broadcast %cst_185 : f32 to vector<8x128xf32>
    %526 = arith.addf %525, %524 : vector<8x128xf32>
    %527 = arith.divf %525, %526 : vector<8x128xf32>
    %cst_186 = arith.constant 2.000000e+00 : f32
    %528 = vector.broadcast %cst_186 : f32 to vector<8x128xf32>
    %529 = arith.mulf %528, %527 : vector<8x128xf32>
    %cst_187 = arith.constant 1.000000e+00 : f32
    %530 = vector.broadcast %cst_187 : f32 to vector<8x128xf32>
    %531 = arith.subf %529, %530 : vector<8x128xf32>
    %532 = arith.select %170, %527, %531 : vector<8x128xi1>, vector<8x128xf32>
    %533 = vector.extract_strided_slice %532 {offsets = [0, 0], sizes = [8, 32], strides = [1, 1]} : vector<8x128xf32> to vector<8x32xf32>
    %534 = vector.extract_strided_slice %532 {offsets = [0, 32], sizes = [8, 32], strides = [1, 1]} : vector<8x128xf32> to vector<8x32xf32>
    %535 = vector.extract_strided_slice %532 {offsets = [0, 64], sizes = [8, 32], strides = [1, 1]} : vector<8x128xf32> to vector<8x32xf32>
    %536 = vector.extract_strided_slice %532 {offsets = [0, 96], sizes = [8, 32], strides = [1, 1]} : vector<8x128xf32> to vector<8x32xf32>
    %537 = arith.mulf %534, %487 : vector<8x32xf32>
    %538 = arith.mulf %533, %536 : vector<8x32xf32>
    %539 = arith.addf %537, %538 : vector<8x32xf32>
    %540 = math.tanh %539 : vector<8x32xf32>
    %541 = arith.mulf %535, %540 : vector<8x32xf32>
    %c48 = arith.constant 48 : index
    %c0_188 = arith.constant 0 : index
    %542 = vector.load %arg15[%c48, %c0_188] : memref<64x32xf32, #tpu.memory_space<vmem>>, vector<8x32xf32>
    tpu.vector_store %arg15[%c48, %c0_188], %541 {strides = array<i32>} : memref<64x32xf32, #tpu.memory_space<vmem>>, vector<8x32xf32>,
    %cst_189 = arith.constant dense<0.000000e+00> : vector<8x128xf32>
    %543 = tpu.matmul %516, %162, %cst_189 {dimension_numbers = #tpu.dot_dimension_numbers<[1], [0], [0], [1], [0, 0, 1, 1], [], []>} : vector<8x32xf32>, vector<32x128xf32>, vector<8x128xf32> -> vector<8x128xf32>
    %cst_190 = arith.constant dense<0.000000e+00> : vector<8x128xf32>
    %544 = tpu.matmul %541, %164, %cst_190 {dimension_numbers = #tpu.dot_dimension_numbers<[1], [0], [0], [1], [0, 0, 1, 1], [], []>} : vector<8x32xf32>, vector<32x128xf32>, vector<8x128xf32> -> vector<8x128xf32>
    %545 = vector.extract_strided_slice %161 {offsets = [56, 0], sizes = [8, 128], strides = [1, 1]} : vector<64x128xf32> to vector<8x128xf32>
    %546 = arith.addf %545, %543 : vector<8x128xf32>
    %cst_191 = arith.constant 2.000000e+00 : f32
    %547 = vector.broadcast %cst_191 : f32 to vector<8x128xf32>
    %548 = arith.mulf %547, %546 : vector<8x128xf32>
    %549 = arith.select %170, %546, %548 : vector<8x128xi1>, vector<8x128xf32>
    %550 = arith.negf %549 : vector<8x128xf32>
    %551 = math.exp %550 : vector<8x128xf32>
    %cst_192 = arith.constant 1.000000e+00 : f32
    %552 = vector.broadcast %cst_192 : f32 to vector<8x128xf32>
    %553 = arith.addf %552, %551 : vector<8x128xf32>
    %554 = arith.divf %552, %553 : vector<8x128xf32>
    %cst_193 = arith.constant 2.000000e+00 : f32
    %555 = vector.broadcast %cst_193 : f32 to vector<8x128xf32>
    %556 = arith.mulf %555, %554 : vector<8x128xf32>
    %cst_194 = arith.constant 1.000000e+00 : f32
    %557 = vector.broadcast %cst_194 : f32 to vector<8x128xf32>
    %558 = arith.subf %556, %557 : vector<8x128xf32>
    %559 = arith.select %170, %554, %558 : vector<8x128xi1>, vector<8x128xf32>
    %560 = vector.extract_strided_slice %559 {offsets = [0, 0], sizes = [8, 32], strides = [1, 1]} : vector<8x128xf32> to vector<8x32xf32>
    %561 = vector.extract_strided_slice %559 {offsets = [0, 32], sizes = [8, 32], strides = [1, 1]} : vector<8x128xf32> to vector<8x32xf32>
    %562 = vector.extract_strided_slice %559 {offsets = [0, 64], sizes = [8, 32], strides = [1, 1]} : vector<8x128xf32> to vector<8x32xf32>
    %563 = vector.extract_strided_slice %559 {offsets = [0, 96], sizes = [8, 32], strides = [1, 1]} : vector<8x128xf32> to vector<8x32xf32>
    %564 = arith.mulf %561, %514 : vector<8x32xf32>
    %565 = arith.mulf %560, %563 : vector<8x32xf32>
    %566 = arith.addf %564, %565 : vector<8x32xf32>
    %567 = math.tanh %566 : vector<8x32xf32>
    %568 = arith.mulf %562, %567 : vector<8x32xf32>
    %cst_195 = arith.constant dense<0.000000e+00> : vector<8x128xf32>
    %569 = tpu.matmul %568, %163, %cst_195 {dimension_numbers = #tpu.dot_dimension_numbers<[1], [0], [0], [1], [0, 0, 1, 1], [], []>} : vector<8x32xf32>, vector<32x128xf32>, vector<8x128xf32> -> vector<8x128xf32>
    %570 = arith.addf %569, %544 : vector<8x128xf32>
    %571 = arith.addf %570, %167 : vector<8x128xf32>
    %cst_196 = arith.constant 2.000000e+00 : f32
    %572 = vector.broadcast %cst_196 : f32 to vector<8x128xf32>
    %573 = arith.mulf %572, %571 : vector<8x128xf32>
    %574 = arith.select %170, %571, %573 : vector<8x128xi1>, vector<8x128xf32>
    %575 = arith.negf %574 : vector<8x128xf32>
    %576 = math.exp %575 : vector<8x128xf32>
    %cst_197 = arith.constant 1.000000e+00 : f32
    %577 = vector.broadcast %cst_197 : f32 to vector<8x128xf32>
    %578 = arith.addf %577, %576 : vector<8x128xf32>
    %579 = arith.divf %577, %578 : vector<8x128xf32>
    %cst_198 = arith.constant 2.000000e+00 : f32
    %580 = vector.broadcast %cst_198 : f32 to vector<8x128xf32>
    %581 = arith.mulf %580, %579 : vector<8x128xf32>
    %cst_199 = arith.constant 1.000000e+00 : f32
    %582 = vector.broadcast %cst_199 : f32 to vector<8x128xf32>
    %583 = arith.subf %581, %582 : vector<8x128xf32>
    %584 = arith.select %170, %579, %583 : vector<8x128xi1>, vector<8x128xf32>
    %585 = vector.extract_strided_slice %584 {offsets = [0, 0], sizes = [8, 32], strides = [1, 1]} : vector<8x128xf32> to vector<8x32xf32>
    %586 = vector.extract_strided_slice %584 {offsets = [0, 32], sizes = [8, 32], strides = [1, 1]} : vector<8x128xf32> to vector<8x32xf32>
    %587 = vector.extract_strided_slice %584 {offsets = [0, 64], sizes = [8, 32], strides = [1, 1]} : vector<8x128xf32> to vector<8x32xf32>
    %588 = vector.extract_strided_slice %584 {offsets = [0, 96], sizes = [8, 32], strides = [1, 1]} : vector<8x128xf32> to vector<8x32xf32>
    %589 = arith.mulf %586, %539 : vector<8x32xf32>
    %590 = arith.mulf %585, %588 : vector<8x32xf32>
    %591 = arith.addf %589, %590 : vector<8x32xf32>
    %592 = math.tanh %591 : vector<8x32xf32>
    %593 = arith.mulf %587, %592 : vector<8x32xf32>
    %c56 = arith.constant 56 : index
    %c0_200 = arith.constant 0 : index
    %594 = vector.load %arg15[%c56, %c0_200] : memref<64x32xf32, #tpu.memory_space<vmem>>, vector<8x32xf32>
    tpu.vector_store %arg15[%c56, %c0_200], %593 {strides = array<i32>} : memref<64x32xf32, #tpu.memory_space<vmem>>, vector<8x32xf32>,
    %c0_201 = arith.constant 0 : index
    %c0_202 = arith.constant 0 : index
    %c0_203 = arith.constant 0 : index
    %595 = vector.load %arg13[%c0_201, %c0_202, %c0_203] : memref<2x8x32xf32, #tpu.memory_space<vmem>>, vector<1x8x32xf32>
    %596 = vector.shape_cast %595 : vector<1x8x32xf32> to vector<8x32xf32>
    %597 = vector.shape_cast %568 : vector<8x32xf32> to vector<1x8x32xf32>
    tpu.vector_store %arg13[%c0_201, %c0_202, %c0_203], %597 {strides = array<i32>} : memref<2x8x32xf32, #tpu.memory_space<vmem>>, vector<1x8x32xf32>,
    %c1_204 = arith.constant 1 : index
    %c0_205 = arith.constant 0 : index
    %c0_206 = arith.constant 0 : index
    %598 = vector.load %arg13[%c1_204, %c0_205, %c0_206] : memref<2x8x32xf32, #tpu.memory_space<vmem>>, vector<1x8x32xf32>
    %599 = vector.shape_cast %598 : vector<1x8x32xf32> to vector<8x32xf32>
    %600 = vector.shape_cast %593 : vector<8x32xf32> to vector<1x8x32xf32>
    tpu.vector_store %arg13[%c1_204, %c0_205, %c0_206], %600 {strides = array<i32>} : memref<2x8x32xf32, #tpu.memory_space<vmem>>, vector<1x8x32xf32>,
    %c0_207 = arith.constant 0 : index
    %c0_208 = arith.constant 0 : index
    %c0_209 = arith.constant 0 : index
    %601 = vector.load %arg14[%c0_207, %c0_208, %c0_209] : memref<2x8x32xf32, #tpu.memory_space<vmem>>, vector<1x8x32xf32>
    %602 = vector.shape_cast %601 : vector<1x8x32xf32> to vector<8x32xf32>
    %603 = vector.shape_cast %566 : vector<8x32xf32> to vector<1x8x32xf32>
    tpu.vector_store %arg14[%c0_207, %c0_208, %c0_209], %603 {strides = array<i32>} : memref<2x8x32xf32, #tpu.memory_space<vmem>>, vector<1x8x32xf32>,
    %c1_210 = arith.constant 1 : index
    %c0_211 = arith.constant 0 : index
    %c0_212 = arith.constant 0 : index
    %604 = vector.load %arg14[%c1_210, %c0_211, %c0_212] : memref<2x8x32xf32, #tpu.memory_space<vmem>>, vector<1x8x32xf32>
    %605 = vector.shape_cast %604 : vector<1x8x32xf32> to vector<8x32xf32>
    %606 = vector.shape_cast %591 : vector<8x32xf32> to vector<1x8x32xf32>
    tpu.vector_store %arg14[%c1_210, %c0_211, %c0_212], %606 {strides = array<i32>} : memref<2x8x32xf32, #tpu.memory_space<vmem>>, vector<1x8x32xf32>,
    %c0_213 = arith.constant 0 : index
    %c0_214 = arith.constant 0 : index
    %607 = vector.load %arg15[%c0_213, %c0_214] : memref<64x32xf32, #tpu.memory_space<vmem>>, vector<64x32xf32>
    %c0_215 = arith.constant 0 : index
    %c0_216 = arith.constant 0 : index
    %608 = vector.load %arg10[%c0_215, %c0_216] : memref<32x128xf32, #tpu.memory_space<vmem>>, vector<32x128xf32>
    %cst_217 = arith.constant dense<0.000000e+00> : vector<64x128xf32>
    %609 = tpu.matmul %607, %608, %cst_217 {dimension_numbers = #tpu.dot_dimension_numbers<[1], [0], [0], [1], [0, 0, 1, 1], [], []>} : vector<64x32xf32>, vector<32x128xf32>, vector<64x128xf32> -> vector<64x128xf32>
    %c0_218 = arith.constant 0 : index
    %c0_219 = arith.constant 0 : index
    %610 = vector.load %arg11[%c0_218, %c0_219] : memref<1x128xf32, #tpu.memory_space<vmem>>, vector<1x128xf32>
    %611 = vector.broadcast %610 : vector<1x128xf32> to vector<64x128xf32>
    %612 = arith.addf %609, %611 : vector<64x128xf32>
    %c0_220 = arith.constant 0 : index
    %c0_221 = arith.constant 0 : index
    %613 = vector.load %arg12[%c0_220, %c0_221] : memref<64x128xf32, #tpu.memory_space<vmem>>, vector<64x128xf32>
    tpu.vector_store %arg12[%c0_220, %c0_221], %612 {strides = array<i32>} : memref<64x128xf32, #tpu.memory_space<vmem>>, vector<64x128xf32>,
    return
  }
}

</mosaic_0001>

<bundles_post_ra>
// kernel: forward.1
= control target key start
LH: loop header
LB: loop body
LE: loop exit
PB: predicated region body
PF: predicated region fallthrough
CT: control target
= control target key end

     0   :  { %20 = vsyncpa [#allocation4], 0  ;;  %s1916_s16 = smov [#allocation3]   ;;  %s2685_s0 = inlined_call_operand.vmem [shape: s32[8,2], index: 0, kind: input, shape index: {}]   ;;  %s2686_s1 = inlined_call_operand.vmem [shape: f32[2,8,32], index: 1, kind: input, shape index: {}, may-alias: {1,2}]   ;;  %s2687_s2 = inlined_call_operand.vmem [shape: f32[2,8,32], index: 2, kind: input, shape index: {}, may-alias: {1,2}]   ;;  %s2688_s3 = inlined_call_operand.vmem [shape: f32[128,32], index: 3, kind: input, shape index: {}]   ;;  %s2689_s4 = inlined_call_operand.vmem [shape: f32[32,128], index: 4, kind: input, shape index: {}]   ;;  %s2690_s5 = inlined_call_operand.vmem [shape: f32[32,128], index: 5, kind: input, shape index: {}]   ;;  %s2691_s6 = inlined_call_operand.vmem [shape: f32[1,128], index: 6, kind: input, shape index: {}]   ;;  %s2692_s7 = inlined_call_operand.vmem [shape: f32[32,128], index: 7, kind: input, shape index: {}]   ;;  %s2693_s8 = inlined_call_operand.vmem [shape: f32[32,128], index: 8, kind: input, shape index: {}]   ;;  %s2694_s9 = inlined_call_operand.vmem [shape: f32[1,128], index: 9, kind: input, shape index: {}]   ;;  %s2695_s10 = inlined_call_operand.vmem [shape: f32[32,128], index: 10, kind: input, shape index: {}]   ;;  %s2696_s11 = inlined_call_operand.vmem [shape: f32[1,128], index: 11, kind: input, shape index: {}]   ;;  %s2697_s12 = inlined_call_operand.vmem [shape: f32[64,128], index: 12, kind: output, shape index: {0}]   ;;  %s2698_s13 = inlined_call_operand.vmem [shape: f32[2,8,32], index: 13, kind: output, shape index: {1}]   ;;  %s2699_s14 = inlined_call_operand.vmem [shape: f32[2,8,32], index: 14, kind: output, shape index: {2}]  }
   0x1   :  { %s26_s15 = sshll.u32 %s2685_s0, 4  ;;  %s27_s15 = int_to_ptr.vmem [resolvable:$true] %s26_s15 }
   0x2   :  { %29 = dma.vmem_to_smem %s27_s15, 128, %s1916_s16, [#allocation4]  }
   0x3   :  { %1914 = dma.done.wait [#allocation4], 128  }
   0x4   :  { %1915 = vsyncadd [#allocation4], 4294967168 }
   0x5   :  { %56 = sfence }
   0x6   :  { %v160_v0 = vld [vmem:[%s2688_s3 + $0x78] sm:$0xff]  ;;  %v159_v1 = vld [vmem:[%s2688_s3 + $0x70] sm:$0xff]  ;;  %v158_v2 = vld [vmem:[%s2688_s3 + $0x68] sm:$0xff]  ;;  %s61_s28 = sld [smem:[#allocation3]]  ;;  %v57_v8 = vlaneseq  ;;  %v1917_v21 = vmov 0.0  }
   0x7   :  { %161 = vmatpush.msra.mxu0 %v160_v0  ;;  %v157_v3 = vld [vmem:[%s2688_s3 + $0x60] sm:$0xff]  ;;  %v156_v4 = vld [vmem:[%s2688_s3 + $0x58] sm:$0xff]  ;;  %v155_v5 = vld [vmem:[%s2688_s3 + $0x50] sm:$0xff]  ;;  %s1676_s17 = sld [smem:[#allocation3 + $0x1]] }
   0x8   :  { %v154_v6 = vld [vmem:[%s2688_s3 + $0x48] sm:$0xff]  ;;  %v153_v7 = vld [vmem:[%s2688_s3 + $0x40] sm:$0xff]  ;;  %v152_v9 = vld [vmem:[%s2688_s3 + $0x38] sm:$0xff]  ;;  %v2029_v11 = vand.u32 127, %v57_v8  ;;  %v2031_v12 = vshrl.u32 %v57_v8, 7  ;;  %s1677_s22 = sld [smem:[#allocation3 + $0x80]] }
   0x9   :  { %162 = vmatpush.msra.mxu0 %v159_v1  ;;  %v151_v10 = vld [vmem:[%s2688_s3 + $0x30] sm:$0xff]  ;;  %v150_v14 = vld [vmem:[%s2688_s3 + $0x28] sm:$0xff]  ;;  %v149_v15 = vld [vmem:[%s2688_s3 + $0x20] sm:$0xff]  ;;  %s1678_s26 = sld [smem:[#allocation3 + $0x81]] }
   0xa   :  { %vm62_vm0 = vcmp.eq.s32.totalorder %v2031_v12, 0  ;;  %v148_v17 = vld [vmem:[%s2688_s3 + $0x18] sm:$0xff]  ;;  %vm68_vm3 = vcmp.eq.s32.totalorder %v2031_v12, 1  ;;  %v147_v18 = vld [vmem:[%s2688_s3 + $0x10] sm:$0xff]  ;;  %s1680_s16 = sld [smem:[#allocation3 + $0x101]]  ;;  %v146_v20 = vld [vmem:[%s2688_s3 + $0x8] sm:$0xff] }
   0xb   :  { %163 = vmatpush.msra.mxu0 %v158_v2  ;;  %v145_v23 = vld [vmem:[%s2688_s3] sm:$0xff]  ;;  %s1681_s0 = sld [smem:[#allocation3 + $0x180]]  ;;  %v205_v38 = vld [vmem:[%s2689_s4 + $0x18] sm:$0xff]  ;;  %v204_v39 = vld [vmem:[%s2689_s4 + $0x10] sm:$0xff] }
   0xc   :  { %v63_v13 = vstv %s61_s28  ;;  %s1679_s28 = sld [smem:[#allocation3 + $0x100]]  ;;  %247 = vmatpush.msra.mxu1 %v205_v38  ;;  %1767 = vmatpush.msra.mxu2 %v205_v38  ;;  %v203_v42 = vld [vmem:[%s2689_s4 + $0x8] sm:$0xff]  ;;  %v202_v55 = vld [vmem:[%s2689_s4] sm:$0xff]  ;;  %v2128_v60 = vld [vmem:[%s2690_s5 + $0x18] sm:$0xff] }
   0xd   :  { %164 = vmatpush.msra.mxu0 %v157_v3  ;;  %vm64_vm1 = vcmp.eq.s32.totalorder %v2029_v11, %v63_v13  ;;  %v69_v16 = vstv %s1676_s17  ;;  %s1682_s3 = sld [smem:[#allocation3 + $0x181]]  ;;  %v2133_v61 = vld [vmem:[%s2690_s5 + $0x10] sm:$0xff]  ;;  %v2139_v62 = vld [vmem:[%s2690_s5 + $0x8] sm:$0xff]  ;;  %v2145_v63 = vld [vmem:[%s2690_s5] sm:$0xff] }
   0xe   :  { %vm65_vm2 = vmand %vm62_vm0, %vm64_vm1  ;;  %vm70_vm4 = vcmp.eq.s32.totalorder %v2029_v11, %v69_v16  ;;  %v74_v19 = vstv %s1677_s22  ;;  %s1683_s23 = sld [smem:[#allocation3 + $0x200]]  ;;  %248 = vmatpush.msra.mxu1 %v204_v39  ;;  %1768 = vmatpush.msra.mxu2 %v204_v39  ;;  %v2184_v39 = vld [vmem:[%s2693_s8 + $0x18] sm:$0xff] }
   0xf   :  { %165 = vmatpush.msra.mxu0 %v156_v4  ;;  %v66_v22 = vsel %vm65_vm2, 1.0, %v1917_v21  ;;  %vm71_vm5 = vmand %vm68_vm3, %vm70_vm4  ;;  %vm75_vm6 = vcmp.eq.s32.totalorder %v2029_v11, %v74_v19  ;;  %v79_v24 = vstv %s1678_s26  ;;  %s1684_s24 = sld [smem:[#allocation3 + $0x201]]  ;;  %v293_v4 = vld [vmem:[%s2686_s1] sm:$0xff]  ;;  %337 = vmatpush.msra.mxu3 %v2184_v39 }
  0x10   :  { %v72_v25 = vsel %vm71_vm5, 1.0, %v66_v22  ;;  %vm76_vm7 = vmand %vm62_vm0, %vm75_vm6  ;;  %vm80_vm8 = vcmp.eq.s32.totalorder %v2029_v11, %v79_v24  ;;  %s90_s22 = sadd.s32 16, %s1680_s16  ;;  %s1685_s25 = sld [smem:[#allocation3 + $0x280]]  ;;  %249 = vmatpush.msra.mxu1 %v203_v42  ;;  %1769 = vmatpush.msra.mxu2 %v203_v42  ;;  %v2201_v42 = vld [vmem:[%s2693_s8 + $0x8] sm:$0xff] }
  0x11   :  { %166 = vmatpush.msra.mxu0 %v155_v5  ;;  %v77_v27 = vsel %vm76_vm7, 1.0, %v1917_v21  ;;  %vm81_vm9 = vmand %vm68_vm3, %vm80_vm8  ;;  %v91_v28 = vstv %s90_s22  ;;  %v96_v30 = vstv %s1681_s0  ;;  %s1686_s26 = sld [smem:[#allocation3 + $0x281]]  ;;  %v2160_v5 = vld [vmem:[%s2691_s6] ss:$0 sm:$0xff]  ;;  %s1918_s16 = smov 32  }
  0x12   :  { %s84_s21 = sadd.s32 16, %s1679_s28  ;;  %v82_v29 = vsel %vm81_vm9, 1.0, %v77_v27  ;;  %vm92_vm12 = vcmp.eq.s32.totalorder %v2029_v11, %v91_v28  ;;  %vm97_vm14 = vcmp.eq.s32.totalorder %v2029_v11, %v96_v30  ;;  %s1687_s15 = sld [smem:[#allocation3 + $0x300]]  ;;  %250 = vmatpush.msra.mxu1 %v202_v55  ;;  %1770 = vmatpush.msra.mxu2 %v202_v55  ;;  %v2272_v55 = vld [vmem:[%s2694_s9] ss:$0 sm:$0xff] }
  0x13   :  { %167 = vmatpush.msra.mxu0 %v154_v6  ;;  %v85_v26 = vstv %s84_s21  ;;  %vm93_vm13 = vmand %vm68_vm3, %vm92_vm12  ;;  %v101_v32 = vstv %s1682_s3  ;;  %s1688_s18 = sld [smem:[#allocation3 + $0x301]] }
  0x14   :  { %vm86_vm10 = vcmp.eq.s32.totalorder %v2029_v11, %v85_v26  ;;  %vm98_vm15 = vmand %vm62_vm0, %vm97_vm14  ;;  %vm102_vm1 = vcmp.eq.s32.totalorder %v2029_v11, %v101_v32  ;;  %v106_v34 = vstv %s1683_s23  ;;  %s1689_s19 = sld [smem:[#allocation3 + $0x380]]  ;;  %314 = vmatpush.msrb.mxu2 %v2128_v60  ;;  %1125 = vmatpush.msrb.mxu1 %v2184_v39 }
  0x15   :  { %168 = vmatpush.msra.mxu0 %v153_v7  ;;  %vm87_vm11 = vmand %vm62_vm0, %vm86_vm10  ;;  %v99_v35 = vsel %vm98_vm15, 1.0, %v1917_v21  ;;  %vm107_vm4 = vcmp.eq.s32.totalorder %v2029_v11, %v106_v34  ;;  %v111_v36 = vstv %s1684_s24  ;;  %s1690_s20 = sld [smem:[#allocation3 + $0x381]] }
  0x16   :  { %v88_v31 = vsel %vm87_vm11, 1.0, %v1917_v21  ;;  %vm103_vm2 = vmand %vm68_vm3, %vm102_vm1  ;;  %vm112_vm6 = vcmp.eq.s32.totalorder %v2029_v11, %v111_v36  ;;  %v116_v40 = vstv %s1685_s25  ;;  %315 = vmatpush.msrb.mxu2 %v2133_v61 }
  0x17   :  { %169 = vmatpush.msra.mxu0 %v152_v9  ;;  %v94_v33 = vsel %vm93_vm13, 1.0, %v88_v31  ;;  %v104_v37 = vsel %vm103_vm2, 1.0, %v99_v35  ;;  %vm108_vm5 = vmand %vm62_vm0, %vm107_vm4  ;;  %vm117_vm8 = vcmp.eq.s32.totalorder %v2029_v11, %v116_v40  ;;  %v121_v43 = vstv %s1686_s26  ;;  %v294_v31 = vld [vmem:[%s2687_s2] sm:$0xff]  ;;  %v2189_v40 = vld [vmem:[%s2693_s8 + $0x10] sm:$0xff] }
  0x18   :  { %v109_v41 = vsel %vm108_vm5, 1.0, %v1917_v21  ;;  %vm113_vm7 = vmand %vm68_vm3, %vm112_vm6  ;;  %vm122_vm10 = vcmp.eq.s32.totalorder %v2029_v11, %v121_v43  ;;  %v126_v45 = vstv %s1687_s15  ;;  %vm210_vm6 = vcmask 261120   ;;  %316 = vmatpush.msrb.mxu2 %v2139_v62  ;;  %v2207_v43 = vld [vmem:[%s2692_s7 + $0x10] sm:$0xff]  ;;  %338 = vmatpush.msra.mxu3 %v2189_v40 }
  0x19   :  { %170 = vmatpush.msra.mxu0 %v151_v10  ;;  %v114_v44 = vsel %vm113_vm7, 1.0, %v109_v41  ;;  %vm118_vm9 = vmand %vm62_vm0, %vm117_vm8  ;;  %vm127_vm12 = vcmp.eq.s32.totalorder %v2029_v11, %v126_v45  ;;  %v131_v47 = vstv %s1688_s18  ;;  %v2195_v41 = vld [vmem:[%s2692_s7 + $0x18] sm:$0xff]  ;;  %1126 = vmatpush.msrb.mxu1 %v2189_v40  ;;  %v2219_v45 = vld [vmem:[%s2693_s8] sm:$0xff] }
  0x1a   :  { %v119_v46 = vsel %vm118_vm9, 1.0, %v1917_v21  ;;  %vm123_vm11 = vmand %vm68_vm3, %vm122_vm10  ;;  %vm132_vm14 = vcmp.eq.s32.totalorder %v2029_v11, %v131_v47  ;;  %v136_v49 = vstv %s1689_s19  ;;  %317 = vmatpush.msrb.mxu2 %v2145_v63  ;;  %339 = vmatpush.msra.mxu3 %v2201_v42  ;;  %v2229_v47 = vld [vmem:[%s2692_s7] sm:$0xff] }
  0x1b   :  { %171 = vmatpush.msra.mxu0 %v150_v14  ;;  %v124_v48 = vsel %vm123_vm11, 1.0, %v119_v46  ;;  %vm128_vm13 = vmand %vm62_vm0, %vm127_vm12  ;;  %vm137_vm1 = vcmp.eq.s32.totalorder %v2029_v11, %v136_v49  ;;  %v141_v51 = vstv %s1690_s20  ;;  %v1699_v46 = vld [vmem:[%s2686_s1 + $0x8] sm:$0xff]  ;;  %1127 = vmatpush.msrb.mxu1 %v2201_v42  ;;  %s1919_s1 = smov 64  }
  0x1c   :  { %v129_v50 = vsel %vm128_vm13, 1.0, %v1917_v21  ;;  %vm133_vm15 = vmand %vm68_vm3, %vm132_vm14  ;;  %vm142_vm4 = vcmp.eq.s32.totalorder %v2029_v11, %v141_v51  ;;  %340 = vmatpush.msra.mxu3 %v2219_v45 }
  0x1d   :  { %172 = vmatpush.msra.mxu0 %v149_v15  ;;  %v134_v52 = vsel %vm133_vm15, 1.0, %v129_v50  ;;  %vm138_vm2 = vmand %vm62_vm0, %vm137_vm1  ;;  %vm292_vm0 = vcmp.lt.s32.totalorder %v2029_v11, 96  ;;  %1128 = vmatpush.msrb.mxu1 %v2219_v45  ;;  %v1700_v50 = vld [vmem:[%s2687_s2 + $0x8] sm:$0xff] }
  0x1e   :  { %v139_v53 = vsel %vm138_vm2, 1.0, %v1917_v21  ;;  %vm143_vm5 = vmand %vm68_vm3, %vm142_vm4  ;;  %1702 = vmatmul.msk.f32.vlgmr.msra.gmra.mxu3 %vm210_vm6, %v1699_v46 }
  0x1f   :  { %173 = vmatpush.msra.mxu0 %v148_v17  ;;  %v144_v54 = vsel %vm143_vm5, 1.0, %v139_v53  ;;  %479 = vmatpush.msrb.mxu3 %v2128_v60 }
  0x21   :  { %174 = vmatpush.msra.mxu0 %v147_v18  ;;  %480 = vmatpush.msrb.mxu3 %v2133_v61 }
  0x23   :  { %175 = vmatpush.msra.mxu0 %v146_v20  ;;  %481 = vmatpush.msrb.mxu3 %v2139_v62 }
  0x25   :  { %176 = vmatpush.msra.mxu0 %v145_v23  ;;  %482 = vmatpush.msrb.mxu3 %v2145_v63 }
  0x26   :  { %177 = vmatmul.f32.vlgmr.msra.gmra.mxu0 %v72_v25 }
  0x27   :  { %568 = vmatpush.msra.mxu3 %v2195_v41 }
  0x29   :  { %569 = vmatpush.msra.mxu3 %v2207_v43 }
  0x2e   :  { %180 = vmatmul.f32.gmra.mxu0 %v82_v29 }
  0x36   :  { %183 = vmatmul.f32.gmra.mxu0 %v94_v33 }
  0x3e   :  { %186 = vmatmul.f32.gmra.mxu0 %v104_v37 }
  0x46   :  { %189 = vmatmul.f32.gmra.mxu0 %v114_v44  ;;  %v2213_v44 = vld [vmem:[%s2692_s7 + $0x8] sm:$0xff] }
  0x47   :  { %570 = vmatpush.msra.mxu3 %v2213_v44 }
  0x49   :  { %571 = vmatpush.msra.mxu3 %v2229_v47 }
  0x4e   :  { %192 = vmatmul.f32.gmra.mxu0 %v124_v48 }
  0x56   :  { %195 = vmatmul.f32.gmra.mxu0 %v134_v52 }
  0x5e   :  { %198 = vmatmul.f32.gmra.mxu0 %v144_v54 }
  0xa1   :  { %v342_v52 = vpop.f32.mrf.mxu3 }
  0xa3   :  { %v178_v56 = vpop.f32.mrf.mxu0 }
  0xa4   :  { %1691 = vmatmul.msk.f32.vlgmr.msra.gmra.mxu1 %vm210_vm6, %v178_v56 }
  0xa5   :  { %1281 = vmatpush.msra.mxu1 %v2184_v39 }
  0xa7   :  { %1282 = vmatpush.msra.mxu1 %v2189_v40 }
  0xa9   :  { %1283 = vmatpush.msra.mxu1 %v2201_v42 }
  0xab   :  { %v181_v57 = vpop.f32.mrf.mxu0  ;;  %1284 = vmatpush.msra.mxu1 %v2219_v45 }
  0xac   :  { %1692 = vmatmul.msk.f32.gmra.mxu1 %vm210_vm6, %v181_v57 }
  0xb3   :  { %v184_v58 = vpop.f32.mrf.mxu0 }
  0xb4   :  { %1693 = vmatmul.msk.f32.gmra.mxu1 %vm210_vm6, %v184_v58 }
  0xbb   :  { %v187_v59 = vpop.f32.mrf.mxu0 }
  0xbc   :  { %1694 = vmatmul.msk.f32.gmra.mxu1 %vm210_vm6, %v187_v59 }
  0xc3   :  { %v190_v0 = vpop.f32.mrf.mxu0 }
  0xc4   :  { %1695 = vmatmul.msk.f32.gmra.mxu1 %vm210_vm6, %v190_v0 }
  0xcb   :  { %v193_v1 = vpop.f32.mrf.mxu0 }
  0xcc   :  { %1696 = vmatmul.msk.f32.gmra.mxu1 %vm210_vm6, %v193_v1 }
  0xd3   :  { %v196_v2 = vpop.f32.mrf.mxu0 }
  0xd4   :  { %1697 = vmatmul.msk.f32.gmra.mxu1 %vm210_vm6, %v196_v2 }
  0xdb   :  { %v199_v3 = vpop.f32.mrf.mxu0 }
  0xdc   :  { %1698 = vmatmul.msk.f32.vlgmr.msra.gmra.mxu2 %vm210_vm6, %v199_v3 }
  0xdd   :  { %408 = vmatpush.msra.mxu2 %v2195_v41 }
  0xdf   :  { %409 = vmatpush.msra.mxu2 %v2207_v43 }
  0xe1   :  { %410 = vmatpush.msra.mxu2 %v2213_v44 }
  0xe3   :  { %411 = vmatpush.msra.mxu2 %v2229_v47 }
  0xe4   :  { %1701 = vmatmul.msk.f32.vlgmr.msrb.gmra.mxu2 %vm210_vm6, %v293_v4 }
  0xe5   :  { %501 = vmatpush.msrb.mxu2 %v2184_v39 }
  0xe7   :  { %502 = vmatpush.msrb.mxu2 %v2189_v40 }
  0xe9   :  { %503 = vmatpush.msrb.mxu2 %v2201_v42 }
  0xeb   :  { %504 = vmatpush.msrb.mxu2 %v2219_v45 }
 0x121   :  { %v252_v8 = vpop.f32.mrf.mxu1 }
 0x122   :  { %v253_v9 = vadd.f32 %v2160_v5, %v252_v8 }
 0x129   :  { %v255_v53 = vpop.f32.mrf.mxu1 }
 0x12a   :  { %v256_v54 = vadd.f32 %v2160_v5, %v255_v53 }
 0x15f   :  { %v273_v6 = vpop.f32.mrf.mxu2 }
 0x160   :  { %v2163_v7 = vadd.f32 %v2160_v5, %v273_v6 }
 0x167   :  { %v319_v10 = vpop.f32.mrf.mxu2 }
 0x168   :  { %v345_v12 = vadd.f32 %v319_v10, %v253_v9 }
 0x16a   :  { %v346_v13 = vmul.f32 2.0, %v345_v12 }
 0x16c   :  { %v347_v14 = vsel %vm292_vm0, %v345_v12, %v346_v13 }
 0x16d   :  { %v1703_v15 = vmul.f32 -1.442695, %v347_v14 }
 0x16f   :  { %1787 = vpow2.f32 %v1703_v15 }
 0x175   :  { %v1788_v16 = vpop.eup %1787 }
 0x176   :  { %v351_v17 = vadd.f32 1.0, %v1788_v16 }
 0x178   :  { %1789 = vrcp.f32 %v351_v17  ;;  %v363_v21 = vand.u32 2147483648, %v351_v17  ;;  %v361_v23 = vand.u32 2147483647, %v351_v17  ;;  %vm357_vm7 = vweird.f32 %v351_v17 }
 0x17a   :  { %v364_v25 = vor.u32 1.1754944e-38, %v363_v21  ;;  %vm362_vm9 = vcmp.eq.f32.partialorder %v361_v23, 8.507059e+37 }
 0x17e   :  { %v1790_v18 = vpop.eup %1789 }
 0x17f   :  { %v353_v19 = vmul.f32 %v1790_v18, %v351_v17  ;;  %vm358_vm3 = vweird.f32 %v1790_v18 }
 0x180   :  { %vm359_vm8 = vmor %vm357_vm7, %vm358_vm3 }
 0x181   :  { %v354_v20 = vsub.f32 1.0, %v353_v19 }
 0x183   :  { %v355_v22 = vmul.f32 %v1790_v18, %v354_v20 }
 0x185   :  { %v356_v24 = vadd.f32 %v1790_v18, %v355_v22 }
 0x187   :  { %v360_v26 = vsel %vm359_vm8, %v1790_v18, %v356_v24 }
 0x188   :  { %v365_v27 = vsel %vm362_vm9, %v364_v25, %v360_v26 }
 0x189   :  { %v367_v28 = vmul.f32 2.0, %v365_v27 }
 0x18b   :  { %v1704_v29 = vadd.f32 -1.0, %v367_v28 }
 0x18d   :  { %v369_v30 = vsel %vm292_vm0, %v365_v27, %v1704_v29 }
 0x18e   :  { %376 = vrot.lane.b32.xlu0 %v369_v30, %s1918_s16 }
 0x196   :  { %371 = vrot.lane.b32.xlu0 %v294_v31, %s1918_s16 }
 0x200   :  { %v377_v32 = vpop.permute.xlu0 %376 }
 0x201   :  { %v379_v33 = vmul.f32 %v377_v32, %v369_v30 }
 0x203   :  { %381 = vrot.lane.b32.xlu1 %v379_v33, %s1918_s16 }
 0x208   :  { %v372_v34 = vpop.permute.xlu0 %371 }
 0x209   :  { %v374_v35 = vmul.f32 %v372_v34, %v369_v30 }
 0x275   :  { %v382_v36 = vpop.permute.xlu1 %381 }
 0x276   :  { %v2177_v37 = vadd.f32 %v382_v36, %v374_v35 }
 0x278   :  { %1791 = vtanh.f32 %v2177_v37 }
 0x27e   :  { %v1792_v38 = vpop.eup %1791 }
 0x27f   :  { %387 = vrot.lane.b32.xlu1 %v1792_v38, %s1918_s16 }
 0x287   :  { %442 = vrot.lane.b32.xlu1 %v1700_v50, %s1918_s16 }
 0x2f1   :  { %v388_v48 = vpop.permute.xlu1 %387 }
 0x2f2   :  { %v390_v49 = vmul.f32 %v388_v48, %v369_v30 }
 0x2f4   :  { %392 = vrot.lane.b32.xlu2 %v390_v49, %s1919_s1 }
 0x2f9   :  { %v443_v53 = vpop.permute.xlu1 %442 }
 0x34e   :  { %v393_v51 = vpop.permute.xlu2 %392 }
 0x34f   :  { %1705 = vmatmul.msk.f32.vlgmr.msra.gmra.mxu2 %vm210_vm6, %v393_v51  ;;  %1708 = vmatmul.msk.f32.vlgmr.msrb.gmra.mxu3 %vm210_vm6, %v393_v51 }
 0x350   :  { %635 = vmatpush.msra.mxu2 %v2128_v60  ;;  %657 = vmatpush.msrb.mxu3 %v2184_v39 }
 0x352   :  { %636 = vmatpush.msra.mxu2 %v2133_v61  ;;  %658 = vmatpush.msrb.mxu3 %v2189_v40 }
 0x354   :  { %637 = vmatpush.msra.mxu2 %v2139_v62  ;;  %659 = vmatpush.msrb.mxu3 %v2201_v42 }
 0x356   :  { %638 = vmatpush.msra.mxu2 %v2145_v63  ;;  %660 = vmatpush.msrb.mxu3 %v2219_v45 }
 0x3d2   :  { %v413_v56 = vpop.f32.mrf.mxu2  ;;  %v484_v57 = vpop.f32.mrf.mxu3 }
 0x3d3   :  { %v414_v58 = vadd.f32 %v413_v56, %v342_v52  ;;  %v509_v59 = vadd.f32 %v484_v57, %v256_v54 }
 0x3d5   :  { %v416_v0 = vadd.f32 %v2272_v55, %v414_v58  ;;  %v510_v1 = vmul.f32 2.0, %v509_v59 }
 0x3d7   :  { %v417_v2 = vmul.f32 2.0, %v416_v0  ;;  %v511_v3 = vsel %vm292_vm0, %v509_v59, %v510_v1 }
 0x3d8   :  { %v1710_v4 = vmul.f32 -1.442695, %v511_v3 }
 0x3d9   :  { %v418_v6 = vsel %vm292_vm0, %v416_v0, %v417_v2 }
 0x3da   :  { %v1706_v8 = vmul.f32 -1.442695, %v418_v6  ;;  %1793 = vpow2.f32 %v1710_v4 }
 0x3dc   :  { %1795 = vpow2.f32 %v1706_v8 }
 0x3e0   :  { %v1794_v9 = vpop.eup %1793 }
 0x3e1   :  { %v515_v10 = vadd.f32 1.0, %v1794_v9  ;;  %v2306_v9 = vld [vmem:[%s2695_s10 + $0x10] sm:$0xff] }
 0x3e2   :  { %v1796_v12 = vpop.eup %1795 }
 0x3e3   :  { %v422_v13 = vadd.f32 1.0, %v1796_v12  ;;  %1797 = vrcp.f32 %v515_v10  ;;  %v527_v19 = vand.u32 2147483648, %v515_v10  ;;  %v525_v21 = vand.u32 2147483647, %v515_v10  ;;  %v2318_v12 = vld [vmem:[%s2695_s10] sm:$0xff] }
 0x3e4   :  { %vm521_vm11 = vweird.f32 %v515_v10 }
 0x3e5   :  { %1799 = vrcp.f32 %v422_v13  ;;  %v434_v23 = vand.u32 2147483648, %v422_v13  ;;  %v432_v26 = vand.u32 2147483647, %v422_v13  ;;  %v528_v27 = vor.u32 1.1754944e-38, %v527_v19 }
 0x3e6   :  { %vm526_vm14 = vcmp.eq.f32.partialorder %v525_v21, 8.507059e+37  ;;  %vm428_vm15 = vweird.f32 %v422_v13 }
 0x3e7   :  { %v435_v31 = vor.u32 1.1754944e-38, %v434_v23  ;;  %vm433_vm2 = vcmp.eq.f32.partialorder %v432_v26, 8.507059e+37 }
 0x3e9   :  { %v1798_v14 = vpop.eup %1797 }
 0x3ea   :  { %v517_v15 = vmul.f32 %v1798_v14, %v515_v10  ;;  %vm522_vm10 = vweird.f32 %v1798_v14  ;;  %v2312_v10 = vld [vmem:[%s2695_s10 + $0x8] sm:$0xff] }
 0x3eb   :  { %v1800_v16 = vpop.eup %1799  ;;  %vm523_vm13 = vmor %vm521_vm11, %vm522_vm10 }
 0x3ec   :  { %v518_v17 = vsub.f32 1.0, %v517_v15  ;;  %v424_v18 = vmul.f32 %v1800_v16, %v422_v13  ;;  %vm429_vm12 = vweird.f32 %v1800_v16 }
 0x3ed   :  { %vm430_vm1 = vmor %vm428_vm15, %vm429_vm12 }
 0x3ee   :  { %v519_v20 = vmul.f32 %v1798_v14, %v518_v17  ;;  %v425_v22 = vsub.f32 1.0, %v424_v18 }
 0x3f0   :  { %v520_v24 = vadd.f32 %v1798_v14, %v519_v20  ;;  %v426_v25 = vmul.f32 %v1800_v16, %v425_v22  ;;  %v258_v20 = vpop.f32.mrf.mxu1 }
 0x3f1   :  { %v259_v21 = vadd.f32 %v2160_v5, %v258_v20 }
 0x3f2   :  { %v524_v28 = vsel %vm523_vm13, %v1798_v14, %v520_v24  ;;  %v427_v29 = vadd.f32 %v1800_v16, %v426_v25 }
 0x3f3   :  { %v529_v30 = vsel %vm526_vm14, %v528_v27, %v524_v28 }
 0x3f4   :  { %v531_v32 = vmul.f32 2.0, %v529_v30  ;;  %v431_v33 = vsel %vm430_vm1, %v1800_v16, %v427_v29  ;;  %v2342_v16 = vld [vmem:[%s2696_s11] ss:$0 sm:$0xff] }
 0x3f5   :  { %v436_v34 = vsel %vm433_vm2, %v435_v31, %v431_v33 }
 0x3f6   :  { %v1711_v35 = vadd.f32 -1.0, %v531_v32  ;;  %v438_v36 = vmul.f32 2.0, %v436_v34 }
 0x3f8   :  { %v533_v38 = vsel %vm292_vm0, %v529_v30, %v1711_v35  ;;  %v1707_v46 = vadd.f32 -1.0, %v438_v36 }
 0x3f9   :  { %536 = vrot.lane.b32.xlu0 %v533_v38, %s1918_s16  ;;  %v534_v59 = vmul.f32 %v533_v38, %v2177_v37  ;;  %v2301_v37 = vld [vmem:[%s2695_s10 + $0x18] sm:$0xff] }
 0x3fa   :  { %v440_v48 = vsel %vm292_vm0, %v436_v34, %v1707_v46  ;;  %1626 = vmatpush.msrb.mxu0 %v2301_v37 }
 0x3fb   :  { %447 = vrot.lane.b32.xlu2 %v440_v48, %s1918_s16  ;;  %v445_v54 = vmul.f32 %v443_v53, %v440_v48 }
 0x3fc   :  { %1627 = vmatpush.msrb.mxu0 %v2306_v9 }
 0x3fe   :  { %1628 = vmatpush.msrb.mxu0 %v2312_v10 }
 0x400   :  { %1629 = vmatpush.msrb.mxu0 %v2318_v12 }
 0x455   :  { %v448_v49 = vpop.permute.xlu2 %447 }
 0x456   :  { %v450_v50 = vmul.f32 %v448_v49, %v440_v48 }
 0x458   :  { %452 = vrot.lane.b32.xlu2 %v450_v50, %s1918_s16 }
 0x46b   :  { %v537_v51 = vpop.permute.xlu0 %536 }
 0x46c   :  { %v539_v52 = vmul.f32 %v537_v51, %v533_v38 }
 0x46e   :  { %541 = vrot.lane.b32.xlu0 %v539_v52, %s1918_s16 }
 0x4b2   :  { %v453_v56 = vpop.permute.xlu2 %452 }
 0x4b3   :  { %v2287_v57 = vadd.f32 %v453_v56, %v445_v54 }
 0x4b5   :  { %1801 = vtanh.f32 %v2287_v57 }
 0x4bb   :  { %v1802_v58 = vpop.eup %1801 }
 0x4bc   :  { %458 = vrot.lane.b32.xlu1 %v1802_v58, %s1918_s16 }
 0x4e0   :  { %v542_v0 = vpop.permute.xlu0 %541 }
 0x4e1   :  { %v2292_v1 = vadd.f32 %v542_v0, %v534_v59 }
 0x4e3   :  { %1803 = vtanh.f32 %v2292_v1 }
 0x4e9   :  { %v1804_v2 = vpop.eup %1803 }
 0x4ea   :  { %547 = vrot.lane.b32.xlu2 %v1804_v2, %s1918_s16 }
 0x52e   :  { %v459_v3 = vpop.permute.xlu1 %458 }
 0x52f   :  { %v461_v4 = vmul.f32 %v459_v3, %v440_v48 }
 0x531   :  { %463 = vrot.lane.b32.xlu0 %v461_v4, %s1919_s1 }
 0x544   :  { %v548_v6 = vpop.permute.xlu2 %547 }
 0x545   :  { %v550_v8 = vmul.f32 %v548_v6, %v533_v38 }
 0x547   :  { %552 = vrot.lane.b32.xlu1 %v550_v8, %s1919_s1 }
 0x5a3   :  { %v464_v13 = vpop.permute.xlu0 %463 }
 0x5a4   :  { %466 = vst.msk [vmem:[#allocation2] sm:$0xff] %vm210_vm6, %v464_v13  ;;  %1709 = vmatmul.msk.f32.vlgmr.msrb.gmra.mxu2 %vm210_vm6, %v464_v13 }
 0x5a5   :  { %724 = vmatpush.msrb.mxu2 %v2195_v41 }
 0x5a7   :  { %725 = vmatpush.msrb.mxu2 %v2207_v43 }
 0x5a9   :  { %726 = vmatpush.msrb.mxu2 %v2213_v44 }
 0x5ab   :  { %v1574_v14 = vld [vmem:[#allocation2] sm:$0xff]  ;;  %727 = vmatpush.msrb.mxu2 %v2229_v47 }
 0x5ac   :  { %1759 = vmatmul.msk.f32.vlgmr.msrb.gmra.mxu0 %vm210_vm6, %v1574_v14 }
 0x5b9   :  { %v553_v15 = vpop.permute.xlu1 %552 }
 0x5ba   :  { %1712 = vmatmul.msk.f32.vlgmr.msra.gmra.mxu3 %vm210_vm6, %v553_v15  ;;  %1715 = vmatmul.msk.f32.vlgmr.msra.gmra.mxu2 %vm210_vm6, %v553_v15 }
 0x5bb   :  { %791 = vmatpush.msra.mxu3 %v2128_v60  ;;  %813 = vmatpush.msra.mxu2 %v2184_v39 }
 0x5bd   :  { %792 = vmatpush.msra.mxu3 %v2133_v61  ;;  %814 = vmatpush.msra.mxu2 %v2189_v40 }
 0x5bf   :  { %793 = vmatpush.msra.mxu3 %v2139_v62  ;;  %815 = vmatpush.msra.mxu2 %v2201_v42 }
 0x5c1   :  { %794 = vmatpush.msra.mxu3 %v2145_v63  ;;  %816 = vmatpush.msra.mxu2 %v2219_v45 }
 0x627   :  { %v506_v19 = vpop.f32.mrf.mxu2 }
 0x629   :  { %v1631_v17 = vpop.f32.mrf.mxu0 }
 0x62a   :  { %v1632_v18 = vadd.f32 %v2342_v16, %v1631_v17 }
 0x62c   :  { %1655 = vst [vmem:[%s2697_s12] sm:$0xff] %v1632_v18 }
 0x63d   :  { %v573_v22 = vpop.f32.mrf.mxu3  ;;  %v640_v23 = vpop.f32.mrf.mxu2 }
 0x63e   :  { %v574_v24 = vadd.f32 %v573_v22, %v506_v19  ;;  %v665_v25 = vadd.f32 %v640_v23, %v259_v21 }
 0x640   :  { %v576_v26 = vadd.f32 %v2272_v55, %v574_v24  ;;  %v666_v27 = vmul.f32 2.0, %v665_v25 }
 0x642   :  { %v577_v28 = vmul.f32 2.0, %v576_v26  ;;  %v667_v29 = vsel %vm292_vm0, %v665_v25, %v666_v27 }
 0x643   :  { %v1717_v30 = vmul.f32 -1.442695, %v667_v29 }
 0x644   :  { %v578_v31 = vsel %vm292_vm0, %v576_v26, %v577_v28 }
 0x645   :  { %v1713_v32 = vmul.f32 -1.442695, %v578_v31  ;;  %1805 = vpow2.f32 %v1717_v30 }
 0x647   :  { %1807 = vpow2.f32 %v1713_v32 }
 0x64b   :  { %v1806_v33 = vpop.eup %1805 }
 0x64c   :  { %v671_v34 = vadd.f32 1.0, %v1806_v33 }
 0x64d   :  { %v1808_v35 = vpop.eup %1807 }
 0x64e   :  { %v582_v36 = vadd.f32 1.0, %v1808_v35  ;;  %1809 = vrcp.f32 %v671_v34  ;;  %v683_v51 = vand.u32 2147483648, %v671_v34  ;;  %v681_v53 = vand.u32 2147483647, %v671_v34 }
 0x64f   :  { %vm677_vm5 = vweird.f32 %v671_v34 }
 0x650   :  { %1811 = vrcp.f32 %v582_v36  ;;  %v594_v56 = vand.u32 2147483648, %v582_v36  ;;  %v592_v0 = vand.u32 2147483647, %v582_v36  ;;  %v684_v2 = vor.u32 1.1754944e-38, %v683_v51 }
 0x651   :  { %vm682_vm8 = vcmp.eq.f32.partialorder %v681_v53, 8.507059e+37  ;;  %vm588_vm9 = vweird.f32 %v582_v36 }
 0x652   :  { %v595_v8 = vor.u32 1.1754944e-38, %v594_v56  ;;  %vm593_vm11 = vcmp.eq.f32.partialorder %v592_v0, 8.507059e+37 }
 0x654   :  { %v1810_v38 = vpop.eup %1809 }
 0x655   :  { %v673_v46 = vmul.f32 %v1810_v38, %v671_v34  ;;  %vm678_vm4 = vweird.f32 %v1810_v38 }
 0x656   :  { %v1812_v48 = vpop.eup %1811  ;;  %vm679_vm7 = vmor %vm677_vm5, %vm678_vm4 }
 0x657   :  { %v674_v49 = vsub.f32 1.0, %v673_v46  ;;  %v584_v50 = vmul.f32 %v1812_v48, %v582_v36  ;;  %vm589_vm3 = vweird.f32 %v1812_v48 }
 0x658   :  { %vm590_vm10 = vmor %vm588_vm9, %vm589_vm3 }
 0x659   :  { %v675_v52 = vmul.f32 %v1810_v38, %v674_v49  ;;  %v585_v54 = vsub.f32 1.0, %v584_v50  ;;  %v261_v50 = vpop.f32.mrf.mxu1 }
 0x65a   :  { %v262_v51 = vadd.f32 %v2160_v5, %v261_v50 }
 0x65b   :  { %v676_v58 = vadd.f32 %v1810_v38, %v675_v52  ;;  %v586_v59 = vmul.f32 %v1812_v48, %v585_v54 }
 0x65d   :  { %v680_v3 = vsel %vm679_vm7, %v1810_v38, %v676_v58  ;;  %v587_v4 = vadd.f32 %v1812_v48, %v586_v59 }
 0x65e   :  { %v685_v6 = vsel %vm682_vm8, %v684_v2, %v680_v3 }
 0x65f   :  { %v687_v13 = vmul.f32 2.0, %v685_v6  ;;  %v591_v14 = vsel %vm590_vm10, %v1812_v48, %v587_v4 }
 0x660   :  { %v596_v15 = vsel %vm593_vm11, %v595_v8, %v591_v14 }
 0x661   :  { %v1718_v17 = vadd.f32 -1.0, %v687_v13  ;;  %v598_v18 = vmul.f32 2.0, %v596_v15 }
 0x663   :  { %v689_v19 = vsel %vm292_vm0, %v685_v6, %v1718_v17  ;;  %v1714_v20 = vadd.f32 -1.0, %v598_v18 }
 0x664   :  { %692 = vrot.lane.b32.xlu0 %v689_v19, %s1918_s16  ;;  %v690_v26 = vmul.f32 %v689_v19, %v2292_v1 }
 0x665   :  { %v600_v21 = vsel %vm292_vm0, %v596_v15, %v1714_v20 }
 0x666   :  { %603 = vrot.lane.b32.xlu2 %v600_v21, %s1918_s16  ;;  %v601_v29 = vmul.f32 %v600_v21, %v2287_v57 }
 0x6c0   :  { %v604_v22 = vpop.permute.xlu2 %603 }
 0x6c1   :  { %v606_v23 = vmul.f32 %v604_v22, %v600_v21 }
 0x6c3   :  { %608 = vrot.lane.b32.xlu1 %v606_v23, %s1918_s16 }
 0x6d6   :  { %v693_v24 = vpop.permute.xlu0 %692 }
 0x6d7   :  { %v695_v25 = vmul.f32 %v693_v24, %v689_v19 }
 0x6d9   :  { %697 = vrot.lane.b32.xlu2 %v695_v25, %s1918_s16 }
 0x733   :  { %v698_v27 = vpop.permute.xlu2 %697 }
 0x734   :  { %v2363_v28 = vadd.f32 %v698_v27, %v690_v26 }
 0x735   :  { %v609_v30 = vpop.permute.xlu1 %608 }
 0x736   :  { %1813 = vtanh.f32 %v2363_v28  ;;  %v2367_v31 = vadd.f32 %v609_v30, %v601_v29 }
 0x738   :  { %1815 = vtanh.f32 %v2367_v31 }
 0x73c   :  { %v1814_v32 = vpop.eup %1813 }
 0x73d   :  { %703 = vrot.lane.b32.xlu1 %v1814_v32, %s1918_s16 }
 0x73e   :  { %v1816_v33 = vpop.eup %1815 }
 0x73f   :  { %614 = vrot.lane.b32.xlu0 %v1816_v33, %s1918_s16 }
 0x7af   :  { %v704_v34 = vpop.permute.xlu1 %703 }
 0x7b0   :  { %v706_v1 = vmul.f32 %v704_v34, %v689_v19 }
 0x7b1   :  { %v615_v35 = vpop.permute.xlu0 %614 }
 0x7b2   :  { %v617_v36 = vmul.f32 %v615_v35, %v600_v21  ;;  %708 = vrot.lane.b32.xlu0 %v706_v1, %s1919_s1 }
 0x7b4   :  { %619 = vrot.lane.b32.xlu2 %v617_v36, %s1919_s1 }
 0x80e   :  { %v620_v57 = vpop.permute.xlu2 %619 }
 0x80f   :  { %622 = vst.msk [vmem:[#allocation2 + $0x8] sm:$0xff] %vm210_vm6, %v620_v57  ;;  %1716 = vmatmul.msk.f32.vlgmr.msrb.gmra.mxu3 %vm210_vm6, %v620_v57 }
 0x810   :  { %880 = vmatpush.msrb.mxu3 %v2195_v41 }
 0x812   :  { %881 = vmatpush.msrb.mxu3 %v2207_v43 }
 0x814   :  { %882 = vmatpush.msrb.mxu3 %v2213_v44 }
 0x816   :  { %v1575_v38 = vld [vmem:[#allocation2 + $0x8] sm:$0xff]  ;;  %883 = vmatpush.msrb.mxu3 %v2229_v47 }
 0x817   :  { %1760 = vmatmul.msk.f32.gmra.mxu0 %vm210_vm6, %v1575_v38 }
 0x824   :  { %v709_v46 = vpop.permute.xlu0 %708 }
 0x825   :  { %1719 = vmatmul.msk.f32.vlgmr.msrb.gmra.mxu2 %vm210_vm6, %v709_v46  ;;  %1722 = vmatmul.msk.f32.vlgmr.msra.gmra.mxu3 %vm210_vm6, %v709_v46 }
 0x826   :  { %947 = vmatpush.msrb.mxu2 %v2128_v60  ;;  %969 = vmatpush.msra.mxu3 %v2184_v39 }
 0x828   :  { %948 = vmatpush.msrb.mxu2 %v2133_v61  ;;  %970 = vmatpush.msra.mxu3 %v2189_v40 }
 0x82a   :  { %949 = vmatpush.msrb.mxu2 %v2139_v62  ;;  %971 = vmatpush.msra.mxu3 %v2201_v42 }
 0x82c   :  { %950 = vmatpush.msrb.mxu2 %v2145_v63  ;;  %972 = vmatpush.msra.mxu3 %v2219_v45 }
 0x892   :  { %v662_v39 = vpop.f32.mrf.mxu3 }
 0x894   :  { %v1634_v48 = vpop.f32.mrf.mxu0 }
 0x895   :  { %v1635_v49 = vadd.f32 %v2342_v16, %v1634_v48 }
 0x897   :  { %1656 = vst [vmem:[%s2697_s12 + $0x8] sm:$0xff] %v1635_v49 }
 0x8a8   :  { %v729_v40 = vpop.f32.mrf.mxu2  ;;  %v796_v52 = vpop.f32.mrf.mxu3 }
 0x8a9   :  { %v730_v53 = vadd.f32 %v729_v40, %v662_v39  ;;  %v821_v54 = vadd.f32 %v796_v52, %v262_v51 }
 0x8ab   :  { %v732_v42 = vadd.f32 %v2272_v55, %v730_v53  ;;  %v822_v56 = vmul.f32 2.0, %v821_v54 }
 0x8ad   :  { %v733_v58 = vmul.f32 2.0, %v732_v42  ;;  %v823_v45 = vsel %vm292_vm0, %v821_v54, %v822_v56 }
 0x8ae   :  { %v1724_v16 = vmul.f32 -1.442695, %v823_v45 }
 0x8af   :  { %v734_v59 = vsel %vm292_vm0, %v732_v42, %v733_v58 }
 0x8b0   :  { %v1720_v0 = vmul.f32 -1.442695, %v734_v59  ;;  %1817 = vpow2.f32 %v1724_v16 }
 0x8b2   :  { %1819 = vpow2.f32 %v1720_v0 }
 0x8b6   :  { %v1818_v2 = vpop.eup %1817 }
 0x8b7   :  { %v827_v3 = vadd.f32 1.0, %v1818_v2  ;;  %v264_v2 = vpop.f32.mrf.mxu1 }
 0x8b8   :  { %v1820_v4 = vpop.eup %1819 }
 0x8b9   :  { %v738_v6 = vadd.f32 1.0, %v1820_v4  ;;  %1821 = vrcp.f32 %v827_v3  ;;  %v839_v18 = vand.u32 2147483648, %v827_v3  ;;  %v837_v20 = vand.u32 2147483647, %v827_v3 }
 0x8ba   :  { %vm833_vm13 = vweird.f32 %v827_v3  ;;  %v265_v4 = vadd.f32 %v2160_v5, %v264_v2 }
 0x8bb   :  { %1823 = vrcp.f32 %v738_v6  ;;  %v750_v22 = vand.u32 2147483648, %v738_v6  ;;  %v748_v25 = vand.u32 2147483647, %v738_v6  ;;  %v840_v26 = vor.u32 1.1754944e-38, %v839_v18 }
 0x8bc   :  { %vm838_vm1 = vcmp.eq.f32.partialorder %v837_v20, 8.507059e+37  ;;  %vm744_vm2 = vweird.f32 %v738_v6 }
 0x8bd   :  { %v751_v32 = vor.u32 1.1754944e-38, %v750_v22  ;;  %vm749_vm5 = vcmp.eq.f32.partialorder %v748_v25, 8.507059e+37 }
 0x8bf   :  { %v1822_v8 = vpop.eup %1821 }
 0x8c0   :  { %v829_v13 = vmul.f32 %v1822_v8, %v827_v3  ;;  %vm834_vm12 = vweird.f32 %v1822_v8 }
 0x8c1   :  { %v1824_v14 = vpop.eup %1823  ;;  %vm835_vm15 = vmor %vm833_vm13, %vm834_vm12 }
 0x8c2   :  { %v830_v15 = vsub.f32 1.0, %v829_v13  ;;  %v740_v17 = vmul.f32 %v1824_v14, %v738_v6  ;;  %vm745_vm14 = vweird.f32 %v1824_v14 }
 0x8c3   :  { %vm746_vm4 = vmor %vm744_vm2, %vm745_vm14 }
 0x8c4   :  { %v831_v19 = vmul.f32 %v1822_v8, %v830_v15  ;;  %v741_v21 = vsub.f32 1.0, %v740_v17 }
 0x8c6   :  { %v832_v23 = vadd.f32 %v1822_v8, %v831_v19  ;;  %v742_v24 = vmul.f32 %v1824_v14, %v741_v21 }
 0x8c8   :  { %v836_v27 = vsel %vm835_vm15, %v1822_v8, %v832_v23  ;;  %v743_v29 = vadd.f32 %v1824_v14, %v742_v24 }
 0x8c9   :  { %v841_v30 = vsel %vm838_vm1, %v840_v26, %v836_v27 }
 0x8ca   :  { %v843_v33 = vmul.f32 2.0, %v841_v30  ;;  %v747_v34 = vsel %vm746_vm4, %v1824_v14, %v743_v29 }
 0x8cb   :  { %v752_v1 = vsel %vm749_vm5, %v751_v32, %v747_v34 }
 0x8cc   :  { %v1725_v35 = vadd.f32 -1.0, %v843_v33  ;;  %v754_v36 = vmul.f32 2.0, %v752_v1 }
 0x8ce   :  { %v845_v57 = vsel %vm292_vm0, %v841_v30, %v1725_v35  ;;  %v1721_v38 = vadd.f32 -1.0, %v754_v36 }
 0x8cf   :  { %848 = vrot.lane.b32.xlu2 %v845_v57, %s1918_s16  ;;  %v846_v51 = vmul.f32 %v845_v57, %v2363_v28 }
 0x8d0   :  { %v756_v46 = vsel %vm292_vm0, %v752_v1, %v1721_v38 }
 0x8d1   :  { %759 = vrot.lane.b32.xlu1 %v756_v46, %s1918_s16  ;;  %v757_v54 = vmul.f32 %v756_v46, %v2367_v31 }
 0x929   :  { %v849_v48 = vpop.permute.xlu2 %848 }
 0x92a   :  { %v851_v49 = vmul.f32 %v849_v48, %v845_v57 }
 0x92c   :  { %853 = vrot.lane.b32.xlu1 %v851_v49, %s1918_s16 }
 0x943   :  { %v760_v39 = vpop.permute.xlu1 %759 }
 0x944   :  { %v762_v50 = vmul.f32 %v760_v39, %v756_v46 }
 0x946   :  { %764 = vrot.lane.b32.xlu0 %v762_v50, %s1918_s16 }
 0x99e   :  { %v854_v40 = vpop.permute.xlu1 %853 }
 0x99f   :  { %v2410_v52 = vadd.f32 %v854_v40, %v846_v51 }
 0x9a1   :  { %1825 = vtanh.f32 %v2410_v52 }
 0x9a7   :  { %v1826_v53 = vpop.eup %1825 }
 0x9a8   :  { %859 = vrot.lane.b32.xlu0 %v1826_v53, %s1918_s16 }
 0x9b8   :  { %v765_v42 = vpop.permute.xlu0 %764 }
 0x9b9   :  { %v2415_v56 = vadd.f32 %v765_v42, %v757_v54 }
 0x9bb   :  { %1827 = vtanh.f32 %v2415_v56 }
 0x9c1   :  { %v1828_v58 = vpop.eup %1827 }
 0x9c2   :  { %770 = vrot.lane.b32.xlu2 %v1828_v58, %s1918_s16 }
 0xa1a   :  { %v860_v45 = vpop.permute.xlu0 %859 }
 0xa1b   :  { %v862_v28 = vmul.f32 %v860_v45, %v845_v57 }
 0xa1c   :  { %v771_v16 = vpop.permute.xlu2 %770 }
 0xa1d   :  { %v773_v59 = vmul.f32 %v771_v16, %v756_v46  ;;  %864 = vrot.lane.b32.xlu2 %v862_v28, %s1919_s1 }
 0xa1f   :  { %775 = vrot.lane.b32.xlu1 %v773_v59, %s1919_s1 }
 0xa77   :  { %v865_v0 = vpop.permute.xlu2 %864 }
 0xa78   :  { %1726 = vmatmul.msk.f32.vlgmr.msrb.gmra.mxu3 %vm210_vm6, %v865_v0 }
 0xa79   :  { %1103 = vmatpush.msrb.mxu3 %v2128_v60 }
 0xa7b   :  { %1104 = vmatpush.msrb.mxu3 %v2133_v61 }
 0xa7d   :  { %1105 = vmatpush.msrb.mxu3 %v2139_v62 }
 0xa7f   :  { %1106 = vmatpush.msrb.mxu3 %v2145_v63 }
 0xa91   :  { %v776_v31 = vpop.permute.xlu1 %775 }
 0xa92   :  { %778 = vst.msk [vmem:[#allocation2 + $0x10] sm:$0xff] %vm210_vm6, %v776_v31  ;;  %1723 = vmatmul.msk.f32.vlgmr.msra.gmra.mxu2 %vm210_vm6, %v776_v31 }
 0xa93   :  { %1036 = vmatpush.msra.mxu2 %v2195_v41 }
 0xa95   :  { %1037 = vmatpush.msra.mxu2 %v2207_v43 }
 0xa97   :  { %1038 = vmatpush.msra.mxu2 %v2213_v44 }
 0xa99   :  { %1039 = vmatpush.msra.mxu2 %v2229_v47 }
 0xa9a   :  { %1729 = vmatmul.msk.f32.vlgmr.msrb.gmra.mxu2 %vm210_vm6, %v865_v0 }
 0xa9b   :  { %1192 = vmatpush.msrb.mxu2 %v2195_v41 }
 0xa9d   :  { %1193 = vmatpush.msrb.mxu2 %v2207_v43 }
 0xa9f   :  { %1194 = vmatpush.msrb.mxu2 %v2213_v44 }
 0xaa1   :  { %1195 = vmatpush.msrb.mxu2 %v2229_v47 }
 0xafb   :  { %v885_v60 = vpop.f32.mrf.mxu3 }
 0xb15   :  { %v818_v61 = vpop.f32.mrf.mxu2 }
 0xb16   :  { %v886_v62 = vadd.f32 %v885_v60, %v818_v61 }
 0xb18   :  { %v888_v63 = vadd.f32 %v2272_v55, %v886_v62 }
 0xb1a   :  { %v889_v3 = vmul.f32 2.0, %v888_v63 }
 0xb1c   :  { %v890_v6 = vsel %vm292_vm0, %v888_v63, %v889_v3 }
 0xb1d   :  { %v1727_v8 = vmul.f32 -1.442695, %v890_v6  ;;  %v952_v13 = vpop.f32.mrf.mxu2 }
 0xb1e   :  { %v977_v14 = vadd.f32 %v952_v13, %v265_v4  ;;  %v1884_v13 = vld [vmem:[%s2690_s5 + $0x10] sm:$0xff] }
 0xb1f   :  { %1829 = vpow2.f32 %v1727_v8 }
 0xb20   :  { %v978_v15 = vmul.f32 2.0, %v977_v14 }
 0xb22   :  { %v979_v17 = vsel %vm292_vm0, %v977_v14, %v978_v15  ;;  %v1885_v15 = vld [vmem:[%s2690_s5 + $0x8] sm:$0xff] }
 0xb23   :  { %v1731_v18 = vmul.f32 -1.442695, %v979_v17  ;;  %v1886_v17 = vld [vmem:[%s2690_s5] sm:$0xff] }
 0xb25   :  { %v1830_v19 = vpop.eup %1829  ;;  %1831 = vpow2.f32 %v1731_v18 }
 0xb26   :  { %v894_v20 = vadd.f32 1.0, %v1830_v19  ;;  %v267_v19 = vpop.f32.mrf.mxu1 }
 0xb28   :  { %1833 = vrcp.f32 %v894_v20  ;;  %v906_v25 = vand.u32 2147483648, %v894_v20  ;;  %v904_v27 = vand.u32 2147483647, %v894_v20  ;;  %vm900_vm7 = vweird.f32 %v894_v20 }
 0xb2a   :  { %v907_v33 = vor.u32 1.1754944e-38, %v906_v25  ;;  %vm905_vm9 = vcmp.eq.f32.partialorder %v904_v27, 8.507059e+37 }
 0xb2b   :  { %v1832_v21 = vpop.eup %1831 }
 0xb2c   :  { %v983_v22 = vadd.f32 1.0, %v1832_v21  ;;  %v2486_v21 = vld [vmem:[%s2691_s6] ss:$0 sm:$0xff] }
 0xb2e   :  { %v1834_v23 = vpop.eup %1833  ;;  %1835 = vrcp.f32 %v983_v22  ;;  %v995_v36 = vand.u32 2147483648, %v983_v22  ;;  %v993_v46 = vand.u32 2147483647, %v983_v22  ;;  %vm989_vm11 = vweird.f32 %v983_v22 }
 0xb2f   :  { %v896_v5 = vmul.f32 %v1834_v23, %v894_v20  ;;  %vm901_vm3 = vweird.f32 %v1834_v23 }
 0xb30   :  { %vm902_vm8 = vmor %vm900_vm7, %vm901_vm3  ;;  %v996_v39 = vor.u32 1.1754944e-38, %v995_v36  ;;  %vm994_vm13 = vcmp.eq.f32.partialorder %v993_v46, 8.507059e+37 }
 0xb31   :  { %v897_v24 = vsub.f32 1.0, %v896_v5 }
 0xb33   :  { %v898_v26 = vmul.f32 %v1834_v23, %v897_v24 }
 0xb34   :  { %v1836_v29 = vpop.eup %1835 }
 0xb35   :  { %v899_v30 = vadd.f32 %v1834_v23, %v898_v26  ;;  %v985_v32 = vmul.f32 %v1836_v29, %v983_v22  ;;  %vm990_vm10 = vweird.f32 %v1836_v29 }
 0xb36   :  { %vm991_vm12 = vmor %vm989_vm11, %vm990_vm10 }
 0xb37   :  { %v903_v34 = vsel %vm902_vm8, %v1834_v23, %v899_v30  ;;  %v986_v1 = vsub.f32 1.0, %v985_v32 }
 0xb38   :  { %v908_v35 = vsel %vm905_vm9, %v907_v33, %v903_v34 }
 0xb39   :  { %v910_v57 = vmul.f32 2.0, %v908_v35  ;;  %v987_v38 = vmul.f32 %v1836_v29, %v986_v1 }
 0xb3b   :  { %v1728_v48 = vadd.f32 -1.0, %v910_v57  ;;  %v988_v49 = vadd.f32 %v1836_v29, %v987_v38 }
 0xb3d   :  { %v912_v50 = vsel %vm292_vm0, %v908_v35, %v1728_v48  ;;  %v992_v51 = vsel %vm991_vm12, %v1836_v29, %v988_v49 }
 0xb3e   :  { %915 = vrot.lane.b32.xlu0 %v912_v50, %s1918_s16  ;;  %v997_v40 = vsel %vm994_vm13, %v996_v39, %v992_v51  ;;  %v913_v59 = vmul.f32 %v912_v50, %v2415_v56 }
 0xb3f   :  { %v999_v53 = vmul.f32 2.0, %v997_v40 }
 0xb41   :  { %v1732_v54 = vadd.f32 -1.0, %v999_v53 }
 0xb43   :  { %v1001_v42 = vsel %vm292_vm0, %v997_v40, %v1732_v54 }
 0xb44   :  { %1004 = vrot.lane.b32.xlu1 %v1001_v42, %s1918_s16  ;;  %v1002_v61 = vmul.f32 %v1001_v42, %v2410_v52  ;;  %v1883_v52 = vld [vmem:[%s2690_s5 + $0x18] sm:$0xff] }
 0xbb0   :  { %v916_v58 = vpop.permute.xlu0 %915 }
 0xbb1   :  { %v918_v45 = vmul.f32 %v916_v58, %v912_v50 }
 0xbb3   :  { %920 = vrot.lane.b32.xlu2 %v918_v45, %s1918_s16 }
 0xbb6   :  { %v1005_v28 = vpop.permute.xlu1 %1004 }
 0xbb7   :  { %v1007_v16 = vmul.f32 %v1005_v28, %v1001_v42 }
 0xbb9   :  { %1009 = vrot.lane.b32.xlu0 %v1007_v16, %s1918_s16 }
 0xc0d   :  { %v921_v0 = vpop.permute.xlu2 %920 }
 0xc0e   :  { %v2452_v31 = vadd.f32 %v921_v0, %v913_v59 }
 0xc10   :  { %1837 = vtanh.f32 %v2452_v31 }
 0xc16   :  { %v1838_v60 = vpop.eup %1837 }
 0xc17   :  { %926 = vrot.lane.b32.xlu1 %v1838_v60, %s1918_s16 }
 0xc2b   :  { %v1010_v62 = vpop.permute.xlu0 %1009 }
 0xc2c   :  { %v2457_v63 = vadd.f32 %v1010_v62, %v1002_v61 }
 0xc2e   :  { %1839 = vtanh.f32 %v2457_v63 }
 0xc34   :  { %v1840_v2 = vpop.eup %1839 }
 0xc35   :  { %1015 = vrot.lane.b32.xlu2 %v1840_v2, %s1918_s16 }
 0xc89   :  { %v927_v3 = vpop.permute.xlu1 %926 }
 0xc8a   :  { %v929_v56 = vmul.f32 %v927_v3, %v912_v50 }
 0xc8c   :  { %931 = vrot.lane.b32.xlu0 %v929_v56, %s1919_s1 }
 0xc8f   :  { %v1016_v4 = vpop.permute.xlu2 %1015 }
 0xc90   :  { %v1018_v6 = vmul.f32 %v1016_v4, %v1001_v42 }
 0xc92   :  { %1020 = vrot.lane.b32.xlu1 %v1018_v6, %s1919_s1 }
 0xcfe   :  { %v932_v8 = vpop.permute.xlu0 %931 }
 0xcff   :  { %934 = vst.msk [vmem:[#allocation2 + $0x18] sm:$0xff] %vm210_vm6, %v932_v8  ;;  %1730 = vmatmul.msk.f32.vlgmr.msra.gmra.mxu3 %vm210_vm6, %v932_v8 }
 0xd00   :  { %1259 = vmatpush.msra.mxu3 %v1883_v52 }
 0xd02   :  { %1260 = vmatpush.msra.mxu3 %v1884_v13 }
 0xd04   :  { %v1021_v14 = vpop.permute.xlu1 %1020  ;;  %1261 = vmatpush.msra.mxu3 %v1885_v15 }
 0xd05   :  { %1733 = vmatmul.msk.f32.vlgmr.msra.gmra.mxu2 %vm210_vm6, %v1021_v14 }
 0xd06   :  { %1262 = vmatpush.msra.mxu3 %v1886_v17  ;;  %1348 = vmatpush.msra.mxu2 %v2195_v41  ;;  %v268_v41 = vadd.f32 %v2486_v21, %v267_v19 }
 0xd07   :  { %1736 = vmatmul.msk.f32.vlgmr.msrb.gmra.mxu3 %vm210_vm6, %v1021_v14 }
 0xd08   :  { %1415 = vmatpush.msrb.mxu3 %v1883_v52  ;;  %1349 = vmatpush.msra.mxu2 %v2207_v43 }
 0xd0a   :  { %1416 = vmatpush.msrb.mxu3 %v1884_v13  ;;  %1350 = vmatpush.msra.mxu2 %v2213_v44 }
 0xd0c   :  { %1417 = vmatpush.msrb.mxu3 %v1885_v15  ;;  %1351 = vmatpush.msra.mxu2 %v2229_v47 }
 0xd0e   :  { %1418 = vmatpush.msrb.mxu3 %v1886_v17 }
 0xd82   :  { %v974_v18 = vpop.f32.mrf.mxu3 }
 0xd88   :  { %v1041_v20 = vpop.f32.mrf.mxu2 }
 0xd89   :  { %v1042_v22 = vadd.f32 %v1041_v20, %v974_v18 }
 0xd8a   :  { %v1108_v23 = vpop.f32.mrf.mxu3 }
 0xd8b   :  { %v1044_v43 = vadd.f32 %v2272_v55, %v1042_v22  ;;  %v1133_v5 = vadd.f32 %v1108_v23, %v268_v41  ;;  %v1888_v22 = vld [vmem:[%s2692_s7 + $0x18] sm:$0xff]  ;;  %v1889_v23 = vld [vmem:[%s2692_s7 + $0x10] sm:$0xff] }
 0xd8d   :  { %v1045_v44 = vmul.f32 2.0, %v1044_v43  ;;  %v1134_v24 = vmul.f32 2.0, %v1133_v5 }
 0xd8f   :  { %v1046_v47 = vsel %vm292_vm0, %v1044_v43, %v1045_v44  ;;  %v1135_v25 = vsel %vm292_vm0, %v1133_v5, %v1134_v24  ;;  %v1890_v43 = vld [vmem:[%s2692_s7 + $0x8] sm:$0xff]  ;;  %v1893_v5 = vld [vmem:[%s2693_s8 + $0x10] sm:$0xff]  ;;  %v1895_v44 = vld [vmem:[%s2693_s8] sm:$0xff]  ;;  %v270_v24 = vpop.f32.mrf.mxu1 }
 0xd90   :  { %v1734_v26 = vmul.f32 -1.442695, %v1046_v47  ;;  %v1738_v27 = vmul.f32 -1.442695, %v1135_v25  ;;  %v271_v47 = vadd.f32 %v2486_v21, %v270_v24  ;;  %v1897_v24 = vld [vmem:[%s2695_s10 + $0x18] sm:$0xff] }
 0xd92   :  { %1841 = vpow2.f32 %v1734_v26 }
 0xd93   :  { %1843 = vpow2.f32 %v1738_v27 }
 0xd98   :  { %v1842_v29 = vpop.eup %1841 }
 0xd99   :  { %v1844_v30 = vpop.eup %1843  ;;  %v1050_v32 = vadd.f32 1.0, %v1842_v29 }
 0xd9a   :  { %v1139_v33 = vadd.f32 1.0, %v1844_v30 }
 0xd9b   :  { %1845 = vrcp.f32 %v1050_v32  ;;  %v1062_v38 = vand.u32 2147483648, %v1050_v32  ;;  %v1060_v49 = vand.u32 2147483647, %v1050_v32  ;;  %vm1056_vm1 = vweird.f32 %v1050_v32 }
 0xd9c   :  { %1847 = vrcp.f32 %v1139_v33  ;;  %v1151_v46 = vand.u32 2147483648, %v1139_v33  ;;  %v1149_v50 = vand.u32 2147483647, %v1139_v33  ;;  %vm1145_vm2 = vweird.f32 %v1139_v33 }
 0xd9d   :  { %v1063_v53 = vor.u32 1.1754944e-38, %v1062_v38  ;;  %vm1061_vm3 = vcmp.eq.f32.partialorder %v1060_v49, 8.507059e+37 }
 0xd9e   :  { %v1152_v54 = vor.u32 1.1754944e-38, %v1151_v46  ;;  %vm1150_vm7 = vcmp.eq.f32.partialorder %v1149_v50, 8.507059e+37 }
 0xda1   :  { %v1846_v55 = vpop.eup %1845 }
 0xda2   :  { %v1848_v34 = vpop.eup %1847  ;;  %v1052_v1 = vmul.f32 %v1846_v55, %v1050_v32  ;;  %vm1057_vm14 = vweird.f32 %v1846_v55 }
 0xda3   :  { %v1141_v35 = vmul.f32 %v1848_v34, %v1139_v33  ;;  %vm1146_vm15 = vweird.f32 %v1848_v34  ;;  %vm1058_vm4 = vmor %vm1056_vm1, %vm1057_vm14 }
 0xda4   :  { %v1053_v36 = vsub.f32 1.0, %v1052_v1  ;;  %vm1147_vm5 = vmor %vm1145_vm2, %vm1146_vm15 }
 0xda5   :  { %v1142_v57 = vsub.f32 1.0, %v1141_v35  ;;  %v2552_v35 = vld [vmem:[%s2694_s9] ss:$0 sm:$0xff] }
 0xda6   :  { %v1054_v48 = vmul.f32 %v1846_v55, %v1053_v36 }
 0xda7   :  { %v1143_v39 = vmul.f32 %v1848_v34, %v1142_v57 }
 0xda8   :  { %v1055_v51 = vadd.f32 %v1846_v55, %v1054_v48 }
 0xda9   :  { %v1144_v40 = vadd.f32 %v1848_v34, %v1143_v39 }
 0xdaa   :  { %v1059_v42 = vsel %vm1058_vm4, %v1846_v55, %v1055_v51 }
 0xdab   :  { %v1148_v58 = vsel %vm1147_vm5, %v1848_v34, %v1144_v40  ;;  %v1064_v45 = vsel %vm1061_vm3, %v1063_v53, %v1059_v42 }
 0xdac   :  { %v1153_v28 = vsel %vm1150_vm7, %v1152_v54, %v1148_v58  ;;  %v1066_v16 = vmul.f32 2.0, %v1064_v45 }
 0xdad   :  { %v1155_v59 = vmul.f32 2.0, %v1153_v28 }
 0xdae   :  { %v1735_v0 = vadd.f32 -1.0, %v1066_v16 }
 0xdaf   :  { %v1739_v60 = vadd.f32 -1.0, %v1155_v59 }
 0xdb0   :  { %v1068_v61 = vsel %vm292_vm0, %v1064_v45, %v1735_v0 }
 0xdb1   :  { %v1157_v62 = vsel %vm292_vm0, %v1153_v28, %v1739_v60  ;;  %1071 = vrot.lane.b32.xlu0 %v1068_v61, %s1918_s16  ;;  %v1069_v6 = vmul.f32 %v1068_v61, %v2452_v31 }
 0xdb2   :  { %1160 = vrot.lane.b32.xlu2 %v1157_v62, %s1918_s16  ;;  %v1158_v8 = vmul.f32 %v1157_v62, %v2457_v63 }
 0xe0c   :  { %v1161_v2 = vpop.permute.xlu2 %1160 }
 0xe0d   :  { %v1163_v3 = vmul.f32 %v1161_v2, %v1157_v62 }
 0xe0f   :  { %1165 = vrot.lane.b32.xlu1 %v1163_v3, %s1918_s16 }
 0xe23   :  { %v1072_v56 = vpop.permute.xlu0 %1071 }
 0xe24   :  { %v1074_v4 = vmul.f32 %v1072_v56, %v1068_v61 }
 0xe26   :  { %1076 = vrot.lane.b32.xlu2 %v1074_v4, %s1918_s16 }
 0xe80   :  { %v1077_v52 = vpop.permute.xlu2 %1076 }
 0xe81   :  { %v1166_v13 = vpop.permute.xlu1 %1165  ;;  %v2504_v14 = vadd.f32 %v1077_v52, %v1069_v6 }
 0xe82   :  { %v2506_v15 = vadd.f32 %v1166_v13, %v1158_v8 }
 0xe83   :  { %1849 = vtanh.f32 %v2504_v14 }
 0xe84   :  { %1851 = vtanh.f32 %v2506_v15 }
 0xe89   :  { %v1850_v17 = vpop.eup %1849 }
 0xe8a   :  { %v1852_v18 = vpop.eup %1851  ;;  %1082 = vrot.lane.b32.xlu1 %v1850_v17, %s1918_s16 }
 0xe8b   :  { %1171 = vrot.lane.b32.xlu0 %v1852_v18, %s1918_s16 }
 0xefc   :  { %v1083_v19 = vpop.permute.xlu1 %1082 }
 0xefd   :  { %v1172_v31 = vpop.permute.xlu0 %1171  ;;  %v1085_v20 = vmul.f32 %v1083_v19, %v1068_v61 }
 0xefe   :  { %v1174_v63 = vmul.f32 %v1172_v31, %v1157_v62 }
 0xeff   :  { %1087 = vrot.lane.b32.xlu0 %v1085_v20, %s1919_s1 }
 0xf00   :  { %1176 = vrot.lane.b32.xlu2 %v1174_v63, %s1919_s1 }
 0xf5a   :  { %v1177_v41 = vpop.permute.xlu2 %1176 }
 0xf5b   :  { %1740 = vmatmul.msk.f32.vlgmr.msrb.gmra.mxu2 %vm210_vm6, %v1177_v41  ;;  %1743 = vmatmul.msk.f32.vlgmr.msra.gmra.mxu3 %vm210_vm6, %v1177_v41 }
 0xf5c   :  { %1772 = vmatpush.msra.mxu3 %v2301_v37  ;;  %1504 = vmatpush.msrb.mxu2 %v1888_v22  ;;  %v1891_v37 = vld [vmem:[%s2692_s7] sm:$0xff]  ;;  %s1920_s7 = smov 96  }
 0xf5e   :  { %1774 = vmatpush.msra.mxu3 %v2306_v9  ;;  %1505 = vmatpush.msrb.mxu2 %v1889_v23 }
 0xf60   :  { %1776 = vmatpush.msra.mxu3 %v2312_v10  ;;  %1506 = vmatpush.msrb.mxu2 %v1890_v43  ;;  %v1892_v10 = vld [vmem:[%s2693_s8 + $0x18] sm:$0xff] }
 0xf62   :  { %1778 = vmatpush.msra.mxu3 %v2318_v12  ;;  %1507 = vmatpush.msrb.mxu2 %v1891_v37  ;;  %v1894_v12 = vld [vmem:[%s2693_s8 + $0x8] sm:$0xff] }
 0xf71   :  { %v1088_v9 = vpop.permute.xlu0 %1087 }
 0xf72   :  { %1090 = vst.msk [vmem:[#allocation2 + $0x20] sm:$0xff] %vm210_vm6, %v1088_v9  ;;  %1737 = vmatmul.msk.f32.vlgmr.msrb.gmra.mxu1 %vm210_vm6, %v1088_v9 }
 0xf73   :  { %1437 = vmatpush.msrb.mxu1 %v1892_v10 }
 0xf75   :  { %1438 = vmatpush.msrb.mxu1 %v1893_v5 }
 0xf77   :  { %1439 = vmatpush.msrb.mxu1 %v1894_v12 }
 0xf79   :  { %1440 = vmatpush.msrb.mxu1 %v1895_v44 }
 0xfde   :  { %v1264_v25 = vpop.f32.mrf.mxu3  ;;  %v1197_v55 = vpop.f32.mrf.mxu2 }
 0xfdf   :  { %v1289_v26 = vadd.f32 %v1264_v25, %v271_v47  ;;  %v1898_v47 = vld [vmem:[%s2695_s10 + $0x10] sm:$0xff] }
 0xfe1   :  { %v1290_v27 = vmul.f32 2.0, %v1289_v26 }
 0xfe3   :  { %v1291_v29 = vsel %vm292_vm0, %v1289_v26, %v1290_v27  ;;  %v1899_v26 = vld [vmem:[%s2695_s10 + $0x8] sm:$0xff]  ;;  %v1900_v27 = vld [vmem:[%s2695_s10] sm:$0xff] }
 0xfe4   :  { %v1745_v30 = vmul.f32 -1.442695, %v1291_v29 }
 0xfe6   :  { %1853 = vpow2.f32 %v1745_v30 }
 0xfec   :  { %v1854_v32 = vpop.eup %1853 }
 0xfed   :  { %v1295_v33 = vadd.f32 1.0, %v1854_v32 }
 0xfef   :  { %1855 = vrcp.f32 %v1295_v33  ;;  %v1130_v34 = vpop.f32.mrf.mxu1  ;;  %v1307_v39 = vand.u32 2147483648, %v1295_v33  ;;  %v1305_v51 = vand.u32 2147483647, %v1295_v33  ;;  %vm1301_vm9 = vweird.f32 %v1295_v33 }
 0xff0   :  { %v1198_v1 = vadd.f32 %v1197_v55, %v1130_v34 }
 0xff1   :  { %v1308_v53 = vor.u32 1.1754944e-38, %v1307_v39  ;;  %vm1306_vm11 = vcmp.eq.f32.partialorder %v1305_v51, 8.507059e+37  ;;  %v2603_v39 = vld [vmem:[%s2696_s11] ss:$0 sm:$0xff] }
 0xff2   :  { %v1200_v21 = vadd.f32 %v2552_v35, %v1198_v1 }
 0xff4   :  { %v1201_v36 = vmul.f32 2.0, %v1200_v21 }
 0xff5   :  { %v1856_v57 = vpop.eup %1855 }
 0xff6   :  { %v1202_v38 = vsel %vm292_vm0, %v1200_v21, %v1201_v36  ;;  %v1297_v46 = vmul.f32 %v1856_v57, %v1295_v33  ;;  %vm1302_vm8 = vweird.f32 %v1856_v57 }
 0xff7   :  { %v1741_v48 = vmul.f32 -1.442695, %v1202_v38  ;;  %vm1303_vm10 = vmor %vm1301_vm9, %vm1302_vm8 }
 0xff8   :  { %v1298_v49 = vsub.f32 1.0, %v1297_v46 }
 0xff9   :  { %1857 = vpow2.f32 %v1741_v48 }
 0xffa   :  { %v1299_v50 = vmul.f32 %v1856_v57, %v1298_v49 }
 0xffc   :  { %v1300_v40 = vadd.f32 %v1856_v57, %v1299_v50 }
 0xffe   :  { %v1304_v54 = vsel %vm1303_vm10, %v1856_v57, %v1300_v40 }
 0xfff   :  { %v1858_v42 = vpop.eup %1857  ;;  %v1309_v58 = vsel %vm1306_vm11, %v1308_v53, %v1304_v54 }
0x1000   :  { %v1206_v45 = vadd.f32 1.0, %v1858_v42  ;;  %v1311_v28 = vmul.f32 2.0, %v1309_v58 }
0x1002   :  { %1859 = vrcp.f32 %v1206_v45  ;;  %v1746_v16 = vadd.f32 -1.0, %v1311_v28  ;;  %v1218_v62 = vand.u32 2147483648, %v1206_v45  ;;  %v1216_v3 = vand.u32 2147483647, %v1206_v45 }
0x1003   :  { %vm1212_vm13 = vweird.f32 %v1206_v45 }
0x1004   :  { %v1313_v59 = vsel %vm292_vm0, %v1309_v58, %v1746_v16  ;;  %v1219_v4 = vor.u32 1.1754944e-38, %v1218_v62  ;;  %vm1217_vm15 = vcmp.eq.f32.partialorder %v1216_v3, 8.507059e+37 }
0x1005   :  { %1316 = vrot.lane.b32.xlu1 %v1313_v59, %s1918_s16  ;;  %v1314_v23 = vmul.f32 %v1313_v59, %v2506_v15 }
0x1008   :  { %v1860_v0 = vpop.eup %1859 }
0x1009   :  { %v1208_v60 = vmul.f32 %v1860_v0, %v1206_v45  ;;  %vm1213_vm12 = vweird.f32 %v1860_v0 }
0x100a   :  { %vm1214_vm14 = vmor %vm1212_vm13, %vm1213_vm12 }
0x100b   :  { %v1209_v61 = vsub.f32 1.0, %v1208_v60 }
0x100d   :  { %v1210_v2 = vmul.f32 %v1860_v0, %v1209_v61 }
0x100f   :  { %v1211_v56 = vadd.f32 %v1860_v0, %v1210_v2 }
0x1011   :  { %v1215_v6 = vsel %vm1214_vm14, %v1860_v0, %v1211_v56 }
0x1012   :  { %v1220_v8 = vsel %vm1217_vm15, %v1219_v4, %v1215_v6 }
0x1013   :  { %v1222_v52 = vmul.f32 2.0, %v1220_v8 }
0x1015   :  { %v1742_v13 = vadd.f32 -1.0, %v1222_v52 }
0x1017   :  { %v1224_v17 = vsel %vm292_vm0, %v1220_v8, %v1742_v13 }
0x1018   :  { %1227 = vrot.lane.b32.xlu2 %v1224_v17, %s1918_s16  ;;  %v1225_v63 = vmul.f32 %v1224_v17, %v2504_v14 }
0x1072   :  { %v1228_v18 = vpop.permute.xlu2 %1227 }
0x1073   :  { %v1230_v19 = vmul.f32 %v1228_v18, %v1224_v17 }
0x1075   :  { %1232 = vrot.lane.b32.xlu1 %v1230_v19, %s1918_s16 }
0x1077   :  { %v1317_v31 = vpop.permute.xlu1 %1316 }
0x1078   :  { %v1319_v20 = vmul.f32 %v1317_v31, %v1313_v59 }
0x107a   :  { %1321 = vrot.lane.b32.xlu0 %v1319_v20, %s1918_s16 }
0x10e7   :  { %v1233_v41 = vpop.permute.xlu1 %1232 }
0x10e8   :  { %v2566_v22 = vadd.f32 %v1233_v41, %v1225_v63 }
0x10ea   :  { %1861 = vtanh.f32 %v2566_v22 }
0x10ec   :  { %v1322_v43 = vpop.permute.xlu0 %1321 }
0x10ed   :  { %v2570_v37 = vadd.f32 %v1322_v43, %v1314_v23 }
0x10ef   :  { %1863 = vtanh.f32 %v2570_v37 }
0x10f0   :  { %v1862_v9 = vpop.eup %1861 }
0x10f1   :  { %1238 = vrot.lane.b32.xlu0 %v1862_v9, %s1918_s16 }
0x10f5   :  { %v1864_v10 = vpop.eup %1863 }
0x10f6   :  { %1327 = vrot.lane.b32.xlu2 %v1864_v10, %s1918_s16 }
0x1150   :  { %v1328_v5 = vpop.permute.xlu2 %1327 }
0x1151   :  { %v1330_v14 = vmul.f32 %v1328_v5, %v1313_v59 }
0x1153   :  { %1332 = vrot.lane.b32.xlu1 %v1330_v14, %s1919_s1 }
0x1163   :  { %v1239_v12 = vpop.permute.xlu0 %1238 }
0x1164   :  { %v1241_v44 = vmul.f32 %v1239_v12, %v1224_v17 }
0x1166   :  { %1243 = vrot.lane.b32.xlu2 %v1241_v44, %s1919_s1 }
0x11c0   :  { %v1244_v15 = vpop.permute.xlu2 %1243 }
0x11c1   :  { %1246 = vst.msk [vmem:[#allocation2 + $0x28] sm:$0xff] %vm210_vm6, %v1244_v15  ;;  %1744 = vmatmul.msk.f32.vlgmr.msra.gmra.mxu1 %vm210_vm6, %v1244_v15 }
0x11c2   :  { %1771 = vmatpush.msra.mxu1 %v1897_v24 }
0x11c4   :  { %1773 = vmatpush.msra.mxu1 %v1898_v47 }
0x11c5   :  { %v1333_v25 = vpop.permute.xlu1 %1332 }
0x11c6   :  { %1747 = vmatmul.msk.f32.vlgmr.msra.gmra.mxu2 %vm210_vm6, %v1333_v25  ;;  %1750 = vmatmul.msk.f32.vlgmr.msrb.gmra.mxu3 %vm210_vm6, %v1333_v25 }
0x11c7   :  { %1775 = vmatpush.msra.mxu1 %v1899_v26 }
0x11c8   :  { %v1579_v29 = vld [vmem:[#allocation2 + $0x28] sm:$0xff] }
0x11c9   :  { %1777 = vmatpush.msra.mxu1 %v1900_v27 }
0x11ce   :  { %1764 = vmatmul.msk.f32.vlgmr.msra.gmra.mxu3 %vm210_vm6, %v1579_v29 }
0x123e   :  { %v1286_v30 = vpop.f32.mrf.mxu1 }
0x1249   :  { %v1353_v32 = vpop.f32.mrf.mxu2  ;;  %v1420_v33 = vpop.f32.mrf.mxu3 }
0x124a   :  { %v1354_v55 = vadd.f32 %v1353_v32, %v1286_v30  ;;  %v1445_v34 = vadd.f32 %v1420_v33, %v2163_v7  ;;  %v1576_v32 = vld [vmem:[#allocation2 + $0x10] sm:$0xff] }
0x124c   :  { %v1356_v1 = vadd.f32 %v2552_v35, %v1354_v55  ;;  %v1446_v21 = vmul.f32 2.0, %v1445_v34  ;;  %v1577_v55 = vld [vmem:[#allocation2 + $0x18] sm:$0xff] }
0x124e   :  { %v1357_v36 = vmul.f32 2.0, %v1356_v1  ;;  %v1447_v57 = vsel %vm292_vm0, %v1445_v34, %v1446_v21  ;;  %v1578_v34 = vld [vmem:[#allocation2 + $0x20] sm:$0xff] }
0x124f   :  { %v1752_v38 = vmul.f32 -1.442695, %v1447_v57 }
0x1250   :  { %v1358_v46 = vsel %vm292_vm0, %v1356_v1, %v1357_v36 }
0x1251   :  { %v1748_v48 = vmul.f32 -1.442695, %v1358_v46  ;;  %1865 = vpow2.f32 %v1752_v38  ;;  %v1646_v49 = vpop.f32.mrf.mxu3 }
0x1252   :  { %v1647_v7 = vadd.f32 %v2603_v39, %v1646_v49 }
0x1253   :  { %1867 = vpow2.f32 %v1748_v48 }
0x1254   :  { %1660 = vst [vmem:[%s2697_s12 + $0x28] sm:$0xff] %v1647_v7 }
0x1257   :  { %v1866_v50 = vpop.eup %1865 }
0x1258   :  { %v1451_v51 = vadd.f32 1.0, %v1866_v50 }
0x1259   :  { %v1868_v40 = vpop.eup %1867 }
0x125a   :  { %v1362_v53 = vadd.f32 1.0, %v1868_v40  ;;  %1869 = vrcp.f32 %v1451_v51  ;;  %v1463_v16 = vand.u32 2147483648, %v1451_v51  ;;  %v1461_v0 = vand.u32 2147483647, %v1451_v51 }
0x125b   :  { %vm1457_vm2 = vweird.f32 %v1451_v51 }
0x125c   :  { %1871 = vrcp.f32 %v1362_v53  ;;  %v1374_v61 = vand.u32 2147483648, %v1362_v53  ;;  %v1372_v3 = vand.u32 2147483647, %v1362_v53  ;;  %v1464_v56 = vor.u32 1.1754944e-38, %v1463_v16 }
0x125d   :  { %vm1462_vm3 = vcmp.eq.f32.partialorder %v1461_v0, 8.507059e+37  ;;  %vm1368_vm7 = vweird.f32 %v1362_v53 }
0x125e   :  { %v1375_v52 = vor.u32 1.1754944e-38, %v1374_v61  ;;  %vm1373_vm9 = vcmp.eq.f32.partialorder %v1372_v3, 8.507059e+37 }
0x1260   :  { %v1870_v54 = vpop.eup %1869 }
0x1261   :  { %v1453_v42 = vmul.f32 %v1870_v54, %v1451_v51  ;;  %vm1458_vm1 = vweird.f32 %v1870_v54 }
0x1262   :  { %v1872_v58 = vpop.eup %1871  ;;  %vm1459_vm5 = vmor %vm1457_vm2, %vm1458_vm1 }
0x1263   :  { %v1454_v45 = vsub.f32 1.0, %v1453_v42  ;;  %v1364_v28 = vmul.f32 %v1872_v58, %v1362_v53  ;;  %vm1369_vm4 = vweird.f32 %v1872_v58 }
0x1264   :  { %vm1370_vm8 = vmor %vm1368_vm7, %vm1369_vm4 }
0x1265   :  { %v1455_v59 = vmul.f32 %v1870_v54, %v1454_v45  ;;  %v1365_v60 = vsub.f32 1.0, %v1364_v28 }
0x1267   :  { %v1456_v62 = vadd.f32 %v1870_v54, %v1455_v59  ;;  %v1366_v2 = vmul.f32 %v1872_v58, %v1365_v60 }
0x1269   :  { %v1460_v4 = vsel %vm1459_vm5, %v1870_v54, %v1456_v62  ;;  %v1367_v6 = vadd.f32 %v1872_v58, %v1366_v2 }
0x126a   :  { %v1465_v8 = vsel %vm1462_vm3, %v1464_v56, %v1460_v4 }
0x126b   :  { %v1467_v13 = vmul.f32 2.0, %v1465_v8  ;;  %v1371_v17 = vsel %vm1370_vm8, %v1872_v58, %v1367_v6 }
0x126c   :  { %v1376_v18 = vsel %vm1373_vm9, %v1375_v52, %v1371_v17 }
0x126d   :  { %v1753_v19 = vadd.f32 -1.0, %v1467_v13  ;;  %v1378_v31 = vmul.f32 2.0, %v1376_v18 }
0x126f   :  { %v1469_v20 = vsel %vm292_vm0, %v1465_v8, %v1753_v19  ;;  %v1749_v63 = vadd.f32 -1.0, %v1378_v31 }
0x1270   :  { %1472 = vrot.lane.b32.xlu0 %v1469_v20, %s1918_s16  ;;  %v1470_v5 = vmul.f32 %v1469_v20, %v2570_v37 }
0x1271   :  { %v1380_v41 = vsel %vm292_vm0, %v1376_v18, %v1749_v63 }
0x1272   :  { %1383 = vrot.lane.b32.xlu1 %v1380_v41, %s1918_s16  ;;  %v1381_v15 = vmul.f32 %v1380_v41, %v2566_v22 }
0x12e2   :  { %v1473_v23 = vpop.permute.xlu0 %1472 }
0x12e3   :  { %v1475_v43 = vmul.f32 %v1473_v23, %v1469_v20 }
0x12e4   :  { %v1384_v9 = vpop.permute.xlu1 %1383 }
0x12e5   :  { %v1386_v10 = vmul.f32 %v1384_v9, %v1380_v41  ;;  %1477 = vrot.lane.b32.xlu2 %v1475_v43, %s1918_s16 }
0x12e7   :  { %1388 = vrot.lane.b32.xlu0 %v1386_v10, %s1918_s16 }
0x133f   :  { %v1478_v14 = vpop.permute.xlu2 %1477 }
0x1340   :  { %v2618_v12 = vadd.f32 %v1478_v14, %v1470_v5 }
0x1342   :  { %1873 = vtanh.f32 %v2618_v12 }
0x1348   :  { %v1874_v44 = vpop.eup %1873 }
0x1349   :  { %1483 = vrot.lane.b32.xlu1 %v1874_v44, %s1918_s16 }
0x1359   :  { %v1389_v24 = vpop.permute.xlu0 %1388 }
0x135a   :  { %v2623_v47 = vadd.f32 %v1389_v24, %v1381_v15 }
0x135c   :  { %1875 = vtanh.f32 %v2623_v47 }
0x1362   :  { %v1876_v25 = vpop.eup %1875 }
0x1363   :  { %1394 = vrot.lane.b32.xlu2 %v1876_v25, %s1918_s16 }
0x13bb   :  { %v1484_v26 = vpop.permute.xlu1 %1483 }
0x13bc   :  { %v1486_v37 = vmul.f32 %v1484_v26, %v1469_v20 }
0x13bd   :  { %v1395_v27 = vpop.permute.xlu2 %1394 }
0x13be   :  { %v1397_v29 = vmul.f32 %v1395_v27, %v1380_v41  ;;  %1488 = vrot.lane.b32.xlu0 %v1486_v37, %s1919_s1 }
0x13c0   :  { %1399 = vrot.lane.b32.xlu1 %v1397_v29, %s1919_s1 }
0x1430   :  { %v1489_v30 = vpop.permute.xlu0 %1488 }
0x1431   :  { %1560 = vst.msk [vmem:[%s2698_s13] sm:$0xff] %vm210_vm6, %v1489_v30  ;;  %1754 = vmatmul.msk.f32.vlgmr.msrb.gmra.mxu2 %vm210_vm6, %v1489_v30 }
0x1432   :  { %v1400_v22 = vpop.permute.xlu1 %1399 }
0x1433   :  { %1402 = vst.msk [vmem:[#allocation2 + $0x30] sm:$0xff] %vm210_vm6, %v1400_v22  ;;  %1751 = vmatmul.msk.f32.vlgmr.msrb.gmra.mxu1 %vm210_vm6, %v1400_v22 }
0x143a   :  { %v1580_v33 = vld [vmem:[#allocation2 + $0x30] sm:$0xff] }
0x143b   :  { %1761 = vmatmul.msk.f32.vlgmr.msra.gmra.mxu1 %vm210_vm6, %v1576_v32  ;;  %1765 = vmatmul.msk.f32.gmra.mxu3 %vm210_vm6, %v1580_v33 }
0x1443   :  { %1762 = vmatmul.msk.f32.gmra.mxu1 %vm210_vm6, %v1577_v55 }
0x144b   :  { %1763 = vmatmul.msk.f32.gmra.mxu1 %vm210_vm6, %v1578_v34 }
0x14b0   :  { %v1442_v1 = vpop.f32.mrf.mxu1 }
0x14b4   :  { %v1509_v21 = vpop.f32.mrf.mxu2 }
0x14b5   :  { %v1510_v36 = vadd.f32 %v1509_v21, %v1442_v1 }
0x14b7   :  { %v1512_v57 = vadd.f32 %v2552_v35, %v1510_v36 }
0x14b8   :  { %v1637_v38 = vpop.f32.mrf.mxu1 }
0x14b9   :  { %v1513_v46 = vmul.f32 2.0, %v1512_v57  ;;  %v1638_v48 = vadd.f32 %v2603_v39, %v1637_v38 }
0x14bb   :  { %v1514_v49 = vsel %vm292_vm0, %v1512_v57, %v1513_v46  ;;  %1657 = vst [vmem:[%s2697_s12 + $0x10] sm:$0xff] %v1638_v48 }
0x14bc   :  { %v1755_v7 = vmul.f32 -1.442695, %v1514_v49 }
0x14be   :  { %1877 = vpow2.f32 %v1755_v7  ;;  %v1649_v50 = vpop.f32.mrf.mxu3 }
0x14bf   :  { %v1650_v51 = vadd.f32 %v2603_v39, %v1649_v50 }
0x14c0   :  { %v1640_v40 = vpop.f32.mrf.mxu1 }
0x14c1   :  { %1661 = vst [vmem:[%s2697_s12 + $0x30] sm:$0xff] %v1650_v51  ;;  %v1641_v35 = vadd.f32 %v2603_v39, %v1640_v40 }
0x14c3   :  { %1658 = vst [vmem:[%s2697_s12 + $0x18] sm:$0xff] %v1641_v35 }
0x14c4   :  { %v1878_v53 = vpop.eup %1877 }
0x14c5   :  { %v1518_v54 = vadd.f32 1.0, %v1878_v53 }
0x14c7   :  { %1879 = vrcp.f32 %v1518_v54  ;;  %v1530_v59 = vand.u32 2147483648, %v1518_v54  ;;  %v1528_v60 = vand.u32 2147483647, %v1518_v54  ;;  %vm1524_vm11 = vweird.f32 %v1518_v54 }
0x14c8   :  { %v1643_v42 = vpop.f32.mrf.mxu1 }
0x14c9   :  { %v1644_v58 = vadd.f32 %v2603_v39, %v1643_v42  ;;  %v1531_v62 = vor.u32 1.1754944e-38, %v1530_v59  ;;  %vm1529_vm13 = vcmp.eq.f32.partialorder %v1528_v60, 8.507059e+37 }
0x14cb   :  { %1659 = vst [vmem:[%s2697_s12 + $0x20] sm:$0xff] %v1644_v58 }
0x14cd   :  { %v1880_v45 = vpop.eup %1879 }
0x14ce   :  { %v1520_v28 = vmul.f32 %v1880_v45, %v1518_v54  ;;  %vm1525_vm10 = vweird.f32 %v1880_v45 }
0x14cf   :  { %vm1526_vm12 = vmor %vm1524_vm11, %vm1525_vm10 }
0x14d0   :  { %v1521_v16 = vsub.f32 1.0, %v1520_v28 }
0x14d2   :  { %v1522_v0 = vmul.f32 %v1880_v45, %v1521_v16 }
0x14d4   :  { %v1523_v61 = vadd.f32 %v1880_v45, %v1522_v0 }
0x14d6   :  { %v1527_v2 = vsel %vm1526_vm12, %v1880_v45, %v1523_v61 }
0x14d7   :  { %v1532_v3 = vsel %vm1529_vm13, %v1531_v62, %v1527_v2 }
0x14d8   :  { %v1534_v56 = vmul.f32 2.0, %v1532_v3 }
0x14da   :  { %v1756_v4 = vadd.f32 -1.0, %v1534_v56 }
0x14dc   :  { %v1536_v6 = vsel %vm292_vm0, %v1532_v3, %v1756_v4 }
0x14dd   :  { %1539 = vrot.lane.b32.xlu2 %v1536_v6, %s1918_s16  ;;  %v1537_v13 = vmul.f32 %v1536_v6, %v2623_v47 }
0x1537   :  { %v1540_v8 = vpop.permute.xlu2 %1539 }
0x1538   :  { %v1542_v52 = vmul.f32 %v1540_v8, %v1536_v6 }
0x153a   :  { %1544 = vrot.lane.b32.xlu0 %v1542_v52, %s1918_s16 }
0x1542   :  { %1564 = vrot.lane.b32.xlu0 %v2618_v12, %s1920_s7 }
0x15ac   :  { %v1545_v17 = vpop.permute.xlu0 %1544 }
0x15ad   :  { %v1547_v18 = vadd.f32 %v1545_v17, %v1537_v13 }
0x15af   :  { %1881 = vtanh.f32 %v1547_v18 }
0x15b4   :  { %v1565_v19 = vpop.permute.xlu0 %1564 }
0x15b5   :  { %v1882_v31 = vpop.eup %1881  ;;  %1567 = vst.msk [vmem:[%s2699_s14] sm:$0xff] %vm210_vm6, %v1565_v19 }
0x15b6   :  { %1550 = vrot.lane.b32.xlu1 %v1882_v31, %s1918_s16 }
0x15be   :  { %1569 = vrot.lane.b32.xlu1 %v1547_v18, %s1920_s7 }
0x1628   :  { %v1551_v11 = vpop.permute.xlu1 %1550 }
0x1629   :  { %v1553_v20 = vmul.f32 %v1551_v11, %v1536_v6 }
0x162b   :  { %1555 = vrot.lane.b32.xlu2 %v1553_v20, %s1919_s1 }
0x1630   :  { %v1570_v63 = vpop.permute.xlu1 %1569 }
0x1631   :  { %1758 = vst.msk [vmem:[%s2699_s14 + $0x8] sm:$0xff] %vm210_vm6, %v1570_v63 }
0x1685   :  { %v1556_v41 = vpop.permute.xlu2 %1555 }
0x1686   :  { %1558 = vst.msk [vmem:[#allocation2 + $0x38] sm:$0xff] %vm210_vm6, %v1556_v41 }
0x1687   :  { %1757 = vst.msk [vmem:[%s2698_s13 + $0x8] sm:$0xff] %vm210_vm6, %v1556_v41 }
0x168d   :  { %v1581_v23 = vld [vmem:[#allocation2 + $0x38] sm:$0xff] }
0x168e   :  { %1766 = vmatmul.msk.f32.gmra.mxu3 %vm210_vm6, %v1581_v23 }
0x1711   :  { %v1652_v43 = vpop.f32.mrf.mxu3 }
0x1712   :  { %v1653_v9 = vadd.f32 %v2603_v39, %v1652_v43 }
0x1714   :  { %1662 = vst [vmem:[%s2697_s12 + $0x38] sm:$0xff] %v1653_v9 }
0x1715   :  { %1675 = vsyncpa [#allocation4], 1 }

</bundles_post_ra>
